<compile_context>
chip_gen: v6e
topology: v6e:2x2x1
jax: 0.10.0
libtpu: 0.0.40
codegen_flags: <defaults>
</compile_context>

<pallas_src>
import math

import jax
import jax.numpy as jnp
import numpy as np
from jax.experimental import pallas as pl
from jax.experimental.pallas import tpu as pltpu

_C1, _C2, _C3, _FC4 = 32, 64, 128, 256   # layer widths fixed by the module
_HIN = 16                                 # spatial size implied by conv_out=128


def _batch_tiling(batch):
    """Rows per grid step (tb) and number of steps (nb)."""
    b8 = 8 * ((batch + 7) // 8)
    if b8 <= 256:
        return b8, 1                       # single step: best MXU fill
    # Large batch: ~256-row steps, rounded to an EVEN step count so both v7x
    # TensorCores get work; tb kept a multiple of 16 (bf16 sublane packing).
    nb = -(-b8 // 256)
    if nb % 2:
        nb += 1
    tb = 16 * ((-(-b8 // nb) + 15) // 16)
    nb = -(-b8 // tb)
    return tb, nb


# -----------------------------------------------------------------------------
# Fused kernel.  One grid step handles one batch tile of `tb` examples.
# cols_ref block: (9, tb, 81*C)  -- axis 0 is the conv2 output position q.
# -----------------------------------------------------------------------------
def _dqn_kernel(cols_ref, w1_ref, b1_ref, w2_ref, b2_ref, w3_ref, b3_ref,
                w4_ref, b4_ref, w5_ref, b5_ref, out_ref):
    f32 = jnp.float32
    bf16 = jnp.bfloat16
    tb = out_ref.shape[0]

    # Hoist bias broadcasts out of the unrolled q-loop (no CSE of broadcasts).
    b1 = jnp.broadcast_to(b1_ref[...], (tb, b1_ref.shape[1]))   # (tb, 288) f32
    b2 = jnp.broadcast_to(b2_ref[...], (tb, b2_ref.shape[1]))   # (tb, 64)  f32
    w1 = w1_ref[...]                                            # (81C, 288) bf16
    w2 = w2_ref[...]                                            # (288, 64)  bf16

    # conv1 (block-diag matmul) -> conv2 (matmul) -> conv3 (accumulate), one
    # conv2/conv3 position q per unrolled iteration; everything stays in vregs.
    acc = jnp.zeros((tb, _C3), f32)
    for q in range(9):
        c_q = cols_ref[q]                                        # (tb, 81C) bf16
        a1 = jnp.dot(c_q, w1, preferred_element_type=f32)        # (tb, 288)
        a1 = jnp.maximum(a1 + b1, 0.0).astype(bf16)
        a2 = jnp.dot(a1, w2, preferred_element_type=f32)         # (tb, 64)
        a2 = jnp.maximum(a2 + b2, 0.0).astype(bf16)
        acc = acc + jnp.dot(a2, w3_ref[q * _C2:(q + 1) * _C2, :],
                            preferred_element_type=f32)          # (tb, 128)
    a3 = jnp.maximum(acc + b3_ref[...], 0.0).astype(bf16)        # == flatten

    # fc4 + ReLU
    a4 = jnp.dot(a3, w4_ref[...], preferred_element_type=f32)
    a4 = jnp.maximum(a4 + b4_ref[...], 0.0).astype(bf16)         # (tb, 256)

    # head: N padded to 128 lanes -> unmasked, lane-dense store.
    out = jnp.dot(a4, w5_ref[...], preferred_element_type=f32) + b5_ref[...]
    out_ref[...] = out.astype(out_ref.dtype)


# -----------------------------------------------------------------------------
# Wrapper-side im2col for conv1, emitted directly in (q, batch, col) order:
#   cols[q, b, (od*9 + k1)*C + ci] = x[b, ci, 4*oh2+2*dh2+dh1, 4*ow2+2*dw2+dw1]
# with q = 3*oh2+ow2 (conv2 output pos), od = 3*dh2+dw2 (conv2 offset),
# k1 = 3*dh1+dw1 (conv1 tap).  One small gather + one transpose per forward.
# -----------------------------------------------------------------------------
def _conv12_im2col(x_nchw):
    bsz, c_in = x_nchw.shape[0], x_nchw.shape[1]
    q = np.arange(9)
    od = np.arange(9)
    k1 = np.arange(9)
    ci = np.arange(c_in)
    h = (4 * (q // 3))[:, None, None] + (2 * (od // 3))[None, :, None] \
        + (k1 // 3)[None, None, :]
    w = (4 * (q % 3))[:, None, None] + (2 * (od % 3))[None, :, None] \
        + (k1 % 3)[None, None, :]
    # flat index into x[b] viewed as (C*H*W,), column order (od, k1, ci)
    idx = (ci[None, None, None, :] * (_HIN * _HIN)
           + h[..., None] * _HIN + w[..., None])                 # (9,9,9,C)
    idx = jnp.asarray(idx.reshape(9, 81 * c_in), jnp.int32)
    xf = x_nchw.reshape(bsz, c_in * _HIN * _HIN)
    cols = jnp.take(xf, idx, axis=1)                             # (B, 9, 81C)
    return jnp.transpose(cols, (1, 0, 2)).astype(jnp.bfloat16)   # (9, B, 81C)


# -----------------------------------------------------------------------------
# Parameter init (PyTorch-default-style uniform) and one-time repacking into
# matmul-ready bf16 layouts (hoisted out of the hot path).
# -----------------------------------------------------------------------------
def init_params(key, in_channels=1, n_actions=4):
    def uniform(k, shape, fan_in):
        bound = 1.0 / math.sqrt(fan_in)
        return jax.random.uniform(k, shape, jnp.float32, -bound, bound)

    keys = jax.random.split(key, 10)
    p = {}
    p["w1"] = uniform(keys[0], (_C1, in_channels, 3, 3), in_channels * 9)
    p["b1"] = uniform(keys[1], (_C1,), in_channels * 9)
    p["w2"] = uniform(keys[2], (_C2, _C1, 3, 3), _C1 * 9)
    p["b2"] = uniform(keys[3], (_C2,), _C1 * 9)
    p["w3"] = uniform(keys[4], (_C3, _C2, 3, 3), _C2 * 9)
    p["b3"] = uniform(keys[5], (_C3,), _C2 * 9)
    p["w4"] = uniform(keys[6], (_FC4, _C3), _C3)
    p["b4"] = uniform(keys[7], (_FC4,), _C3)
    p["w5"] = uniform(keys[8], (n_actions, _FC4), _FC4)
    p["b5"] = uniform(keys[9], (n_actions,), _FC4)
    return p


def pack_params(raw):
    """Repack PyTorch-layout params into kernel-ready matmul layouts (once)."""
    bf16 = jnp.bfloat16
    c_in = raw["w1"].shape[1]
    n_actions = raw["w5"].shape[0]
    k1 = 9 * c_in

    # conv1: (kh, kw, ci, co) rows -> (9C, 32), then block-diagonal (81C, 288)
    # so output column block `od` is conv1 evaluated at conv2 offset `od`.
    w1p = jnp.transpose(raw["w1"], (2, 3, 1, 0)).reshape(k1, _C1)
    w1bd = jnp.zeros((9 * k1, 9 * _C1), jnp.float32)
    for q in range(9):
        w1bd = w1bd.at[q * k1:(q + 1) * k1, q * _C1:(q + 1) * _C1].set(w1p)
    b1t = jnp.tile(raw["b1"], 9)[None, :]                          # (1, 288) f32

    w2m = jnp.transpose(raw["w2"], (2, 3, 1, 0)).reshape(9 * _C1, _C2)   # (288, 64)
    w3m = jnp.transpose(raw["w3"], (2, 3, 1, 0)).reshape(9 * _C2, _C3)   # (576, 128)
    w4m = raw["w4"].T                                              # (128, 256)

    n_pad = 128 * ((n_actions + 127) // 128)
    w5m = jnp.zeros((_FC4, n_pad), jnp.float32).at[:, :n_actions].set(raw["w5"].T)
    b5p = jnp.zeros((1, n_pad), jnp.float32).at[0, :n_actions].set(raw["b5"])

    return {
        "w1": w1bd.astype(bf16), "b1": b1t,
        "w2": w2m.astype(bf16), "b2": raw["b2"][None, :],
        "w3": w3m.astype(bf16), "b3": raw["b3"][None, :],
        "w4": w4m.astype(bf16), "b4": raw["b4"][None, :],
        "w5": w5m.astype(bf16), "b5": b5p,
    }


def _full_spec(arr):
    return pl.BlockSpec(arr.shape, lambda i: (0, 0))


# -----------------------------------------------------------------------------
# Forward pass (matches DQN.forward semantics).
# -----------------------------------------------------------------------------
def dqn_forward(packed, x_nchw, n_actions=4):
    bsz, c_in, hh, ww = x_nchw.shape
    assert (hh, ww) == (_HIN, _HIN), "module implies a 16x16 spatial input"

    tb, nb = _batch_tiling(bsz)
    b_pad = nb * tb
    n_pad = packed["w5"].shape[1]
    k_cols = 81 * c_in

    cols = _conv12_im2col(x_nchw)                                  # (9, B, 81C)
    if b_pad != bsz:
        cols = jnp.pad(cols, ((0, 0), (0, b_pad - bsz), (0, 0)))

    out_pad = pl.pallas_call(
        _dqn_kernel,
        out_shape=jax.ShapeDtypeStruct((b_pad, n_pad), jnp.float32),
        grid=(nb,),
        in_specs=[
            pl.BlockSpec((9, tb, k_cols), lambda i: (0, i, 0)),
            _full_spec(packed["w1"]), _full_spec(packed["b1"]),
            _full_spec(packed["w2"]), _full_spec(packed["b2"]),
            _full_spec(packed["w3"]), _full_spec(packed["b3"]),
            _full_spec(packed["w4"]), _full_spec(packed["b4"]),
            _full_spec(packed["w5"]), _full_spec(packed["b5"]),
        ],
        out_specs=pl.BlockSpec((tb, n_pad), lambda i: (i, 0)),
        compiler_params=pltpu.CompilerParams(
            dimension_semantics=("parallel",)),
    )(cols, packed["w1"], packed["b1"], packed["w2"], packed["b2"],
      packed["w3"], packed["b3"], packed["w4"], packed["b4"],
      packed["w5"], packed["b5"])

    return out_pad[:bsz, :n_actions]


# -----------------------------------------------------------------------------
# Pure-JAX f32 reference of the same math (for the sanity check).
# -----------------------------------------------------------------------------
def _ref_forward(p, xin):
    y = jax.lax.conv_general_dilated(
        xin, p["w1"], (2, 2), "VALID",
        dimension_numbers=("NCHW", "OIHW", "NCHW")) + p["b1"][None, :, None, None]
    y = jnp.maximum(y, 0.0)
    y = jax.lax.conv_general_dilated(
        y, p["w2"], (2, 2), "VALID",
        dimension_numbers=("NCHW", "OIHW", "NCHW")) + p["b2"][None, :, None, None]
    y = jnp.maximum(y, 0.0)
    y = jax.lax.conv_general_dilated(
        y, p["w3"], (1, 1), "VALID",
        dimension_numbers=("NCHW", "OIHW", "NCHW")) + p["b3"][None, :, None, None]
    y = jnp.maximum(y, 0.0)
    y = y.reshape(y.shape[0], -1)
    y = jnp.maximum(y @ p["w4"].T + p["b4"], 0.0)
    return y @ p["w5"].T + p["b5"]


if __name__ == "__main__":
    key = jax.random.PRNGKey(0)
    pkey, xkey = jax.random.split(key)
    raw = init_params(pkey, in_channels=1, n_actions=4)
    packed = pack_params(raw)

    # Input consistent with the module: in_channels=1, 16x16 spatial, batch=2.
    x = jax.random.normal(xkey, (2, 1, 16, 16), jnp.float32)

    out = jax.jit(dqn_forward)(packed, x)
    out = jax.block_until_ready(out)
    assert out.shape == (2, 4), out.shape
    assert out.dtype == jnp.float32

    # bf16 weights/activations on the MXU vs. an exact-f32 reference: relaxed
    # tolerance (was 2e-4 for the all-f32 variant).
    ref = _ref_forward(raw, x)
    assert jnp.allclose(out, ref, atol=5e-2, rtol=5e-2), (
        float(jnp.max(jnp.abs(out - ref))))

    print("KERNEL_OK")
</pallas_src>

<mosaic_0001>
module attributes {stable_mosaic.version = 11 : i64} {
  func.func @_dqn_kernel(%arg0: i32, %arg1: memref<9x8x81xbf16, #tpu.memory_space<vmem>>, %arg2: memref<81x288xbf16, #tpu.memory_space<vmem>>, %arg3: memref<1x288xf32, #tpu.memory_space<vmem>>, %arg4: memref<288x64xbf16, #tpu.memory_space<vmem>>, %arg5: memref<1x64xf32, #tpu.memory_space<vmem>>, %arg6: memref<576x128xbf16, #tpu.memory_space<vmem>>, %arg7: memref<1x128xf32, #tpu.memory_space<vmem>>, %arg8: memref<128x256xbf16, #tpu.memory_space<vmem>>, %arg9: memref<1x256xf32, #tpu.memory_space<vmem>>, %arg10: memref<256x128xbf16, #tpu.memory_space<vmem>>, %arg11: memref<1x128xf32, #tpu.memory_space<vmem>>, %arg12: memref<8x128xf32, #tpu.memory_space<vmem>>) attributes {dimension_semantics = [#tpu.dimension_semantics<parallel>], iteration_bounds = array<i64: 1>, scalar_prefetch = 0 : i64, scratch_operands = 0 : i64, tpu.core_type = #tpu.core_type<tc>, window_params = [{transform_indices = @transform_0, window_bounds = array<i64: 9, 8, 81>}, {pipeline_mode = #tpu.pipeline_mode<synchronous>, transform_indices = @transform_1, window_bounds = array<i64: 81, 288>}, {pipeline_mode = #tpu.pipeline_mode<synchronous>, transform_indices = @transform_2, window_bounds = array<i64: 1, 288>}, {pipeline_mode = #tpu.pipeline_mode<synchronous>, transform_indices = @transform_3, window_bounds = array<i64: 288, 64>}, {pipeline_mode = #tpu.pipeline_mode<synchronous>, transform_indices = @transform_4, window_bounds = array<i64: 1, 64>}, {pipeline_mode = #tpu.pipeline_mode<synchronous>, transform_indices = @transform_5, window_bounds = array<i64: 576, 128>}, {pipeline_mode = #tpu.pipeline_mode<synchronous>, transform_indices = @transform_6, window_bounds = array<i64: 1, 128>}, {pipeline_mode = #tpu.pipeline_mode<synchronous>, transform_indices = @transform_7, window_bounds = array<i64: 128, 256>}, {pipeline_mode = #tpu.pipeline_mode<synchronous>, transform_indices = @transform_8, window_bounds = array<i64: 1, 256>}, {pipeline_mode = #tpu.pipeline_mode<synchronous>, transform_indices = @transform_9, window_bounds = array<i64: 256, 128>}, {pipeline_mode = #tpu.pipeline_mode<synchronous>, transform_indices = @transform_10, window_bounds = array<i64: 1, 128>}, {transform_indices = @transform_11, window_bounds = array<i64: 8, 128>}]} {
    %c0 = arith.constant 0 : index
    %c0_0 = arith.constant 0 : index
    %0 = vector.load %arg3[%c0, %c0_0] : memref<1x288xf32, #tpu.memory_space<vmem>>, vector<1x288xf32>
    %1 = vector.shape_cast %0 : vector<1x288xf32> to vector<1x288xf32>
    %2 = vector.broadcast %1 : vector<1x288xf32> to vector<8x288xf32>
    %c0_1 = arith.constant 0 : index
    %c0_2 = arith.constant 0 : index
    %3 = vector.load %arg5[%c0_1, %c0_2] : memref<1x64xf32, #tpu.memory_space<vmem>>, vector<1x64xf32>
    %4 = vector.shape_cast %3 : vector<1x64xf32> to vector<1x64xf32>
    %5 = vector.broadcast %4 : vector<1x64xf32> to vector<8x64xf32>
    %c0_3 = arith.constant 0 : index
    %c0_4 = arith.constant 0 : index
    %6 = vector.load %arg2[%c0_3, %c0_4] : memref<81x288xbf16, #tpu.memory_space<vmem>>, vector<81x288xbf16>
    %c0_5 = arith.constant 0 : index
    %c0_6 = arith.constant 0 : index
    %7 = vector.load %arg4[%c0_5, %c0_6] : memref<288x64xbf16, #tpu.memory_space<vmem>>, vector<288x64xbf16>
    %cst = arith.constant 0.000000e+00 : f32
    %8 = vector.broadcast %cst : f32 to vector<8x128xf32>
    %c0_7 = arith.constant 0 : index
    %c0_8 = arith.constant 0 : index
    %c0_9 = arith.constant 0 : index
    %9 = vector.load %arg1[%c0_7, %c0_8, %c0_9] : memref<9x8x81xbf16, #tpu.memory_space<vmem>>, vector<1x8x81xbf16>
    %10 = vector.shape_cast %9 : vector<1x8x81xbf16> to vector<8x81xbf16>
    %cst_10 = arith.constant dense<0.000000e+00> : vector<8x288xf32>
    %11 = tpu.matmul %10, %6, %cst_10 {dimension_numbers = #tpu.dot_dimension_numbers<[1], [0], [0], [1], [0, 0, 1, 1], [], []>} : vector<8x81xbf16>, vector<81x288xbf16>, vector<8x288xf32> -> vector<8x288xf32>
    %12 = arith.addf %11, %2 : vector<8x288xf32>
    %cst_11 = arith.constant 0.000000e+00 : f32
    %13 = vector.broadcast %cst_11 : f32 to vector<8x288xf32>
    %14 = arith.maximumf %12, %13 : vector<8x288xf32>
    %15 = arith.truncf %14 : vector<8x288xf32> to vector<8x288xbf16>
    %cst_12 = arith.constant dense<0.000000e+00> : vector<8x64xf32>
    %16 = tpu.matmul %15, %7, %cst_12 {dimension_numbers = #tpu.dot_dimension_numbers<[1], [0], [0], [1], [0, 0, 1, 1], [], []>} : vector<8x288xbf16>, vector<288x64xbf16>, vector<8x64xf32> -> vector<8x64xf32>
    %17 = arith.addf %16, %5 : vector<8x64xf32>
    %cst_13 = arith.constant 0.000000e+00 : f32
    %18 = vector.broadcast %cst_13 : f32 to vector<8x64xf32>
    %19 = arith.maximumf %17, %18 : vector<8x64xf32>
    %20 = arith.truncf %19 : vector<8x64xf32> to vector<8x64xbf16>
    %c0_14 = arith.constant 0 : index
    %c0_15 = arith.constant 0 : index
    %21 = vector.load %arg6[%c0_14, %c0_15] : memref<576x128xbf16, #tpu.memory_space<vmem>>, vector<64x128xbf16>
    %cst_16 = arith.constant dense<0.000000e+00> : vector<8x128xf32>
    %22 = tpu.matmul %20, %21, %cst_16 {dimension_numbers = #tpu.dot_dimension_numbers<[1], [0], [0], [1], [0, 0, 1, 1], [], []>} : vector<8x64xbf16>, vector<64x128xbf16>, vector<8x128xf32> -> vector<8x128xf32>
    %23 = arith.addf %8, %22 : vector<8x128xf32>
    %c1 = arith.constant 1 : index
    %c0_17 = arith.constant 0 : index
    %c0_18 = arith.constant 0 : index
    %24 = vector.load %arg1[%c1, %c0_17, %c0_18] : memref<9x8x81xbf16, #tpu.memory_space<vmem>>, vector<1x8x81xbf16>
    %25 = vector.shape_cast %24 : vector<1x8x81xbf16> to vector<8x81xbf16>
    %cst_19 = arith.constant dense<0.000000e+00> : vector<8x288xf32>
    %26 = tpu.matmul %25, %6, %cst_19 {dimension_numbers = #tpu.dot_dimension_numbers<[1], [0], [0], [1], [0, 0, 1, 1], [], []>} : vector<8x81xbf16>, vector<81x288xbf16>, vector<8x288xf32> -> vector<8x288xf32>
    %27 = arith.addf %26, %2 : vector<8x288xf32>
    %cst_20 = arith.constant 0.000000e+00 : f32
    %28 = vector.broadcast %cst_20 : f32 to vector<8x288xf32>
    %29 = arith.maximumf %27, %28 : vector<8x288xf32>
    %30 = arith.truncf %29 : vector<8x288xf32> to vector<8x288xbf16>
    %cst_21 = arith.constant dense<0.000000e+00> : vector<8x64xf32>
    %31 = tpu.matmul %30, %7, %cst_21 {dimension_numbers = #tpu.dot_dimension_numbers<[1], [0], [0], [1], [0, 0, 1, 1], [], []>} : vector<8x288xbf16>, vector<288x64xbf16>, vector<8x64xf32> -> vector<8x64xf32>
    %32 = arith.addf %31, %5 : vector<8x64xf32>
    %cst_22 = arith.constant 0.000000e+00 : f32
    %33 = vector.broadcast %cst_22 : f32 to vector<8x64xf32>
    %34 = arith.maximumf %32, %33 : vector<8x64xf32>
    %35 = arith.truncf %34 : vector<8x64xf32> to vector<8x64xbf16>
    %c64 = arith.constant 64 : index
    %c0_23 = arith.constant 0 : index
    %36 = vector.load %arg6[%c64, %c0_23] : memref<576x128xbf16, #tpu.memory_space<vmem>>, vector<64x128xbf16>
    %cst_24 = arith.constant dense<0.000000e+00> : vector<8x128xf32>
    %37 = tpu.matmul %35, %36, %cst_24 {dimension_numbers = #tpu.dot_dimension_numbers<[1], [0], [0], [1], [0, 0, 1, 1], [], []>} : vector<8x64xbf16>, vector<64x128xbf16>, vector<8x128xf32> -> vector<8x128xf32>
    %38 = arith.addf %23, %37 : vector<8x128xf32>
    %c2 = arith.constant 2 : index
    %c0_25 = arith.constant 0 : index
    %c0_26 = arith.constant 0 : index
    %39 = vector.load %arg1[%c2, %c0_25, %c0_26] : memref<9x8x81xbf16, #tpu.memory_space<vmem>>, vector<1x8x81xbf16>
    %40 = vector.shape_cast %39 : vector<1x8x81xbf16> to vector<8x81xbf16>
    %cst_27 = arith.constant dense<0.000000e+00> : vector<8x288xf32>
    %41 = tpu.matmul %40, %6, %cst_27 {dimension_numbers = #tpu.dot_dimension_numbers<[1], [0], [0], [1], [0, 0, 1, 1], [], []>} : vector<8x81xbf16>, vector<81x288xbf16>, vector<8x288xf32> -> vector<8x288xf32>
    %42 = arith.addf %41, %2 : vector<8x288xf32>
    %cst_28 = arith.constant 0.000000e+00 : f32
    %43 = vector.broadcast %cst_28 : f32 to vector<8x288xf32>
    %44 = arith.maximumf %42, %43 : vector<8x288xf32>
    %45 = arith.truncf %44 : vector<8x288xf32> to vector<8x288xbf16>
    %cst_29 = arith.constant dense<0.000000e+00> : vector<8x64xf32>
    %46 = tpu.matmul %45, %7, %cst_29 {dimension_numbers = #tpu.dot_dimension_numbers<[1], [0], [0], [1], [0, 0, 1, 1], [], []>} : vector<8x288xbf16>, vector<288x64xbf16>, vector<8x64xf32> -> vector<8x64xf32>
    %47 = arith.addf %46, %5 : vector<8x64xf32>
    %cst_30 = arith.constant 0.000000e+00 : f32
    %48 = vector.broadcast %cst_30 : f32 to vector<8x64xf32>
    %49 = arith.maximumf %47, %48 : vector<8x64xf32>
    %50 = arith.truncf %49 : vector<8x64xf32> to vector<8x64xbf16>
    %c128 = arith.constant 128 : index
    %c0_31 = arith.constant 0 : index
    %51 = vector.load %arg6[%c128, %c0_31] : memref<576x128xbf16, #tpu.memory_space<vmem>>, vector<64x128xbf16>
    %cst_32 = arith.constant dense<0.000000e+00> : vector<8x128xf32>
    %52 = tpu.matmul %50, %51, %cst_32 {dimension_numbers = #tpu.dot_dimension_numbers<[1], [0], [0], [1], [0, 0, 1, 1], [], []>} : vector<8x64xbf16>, vector<64x128xbf16>, vector<8x128xf32> -> vector<8x128xf32>
    %53 = arith.addf %38, %52 : vector<8x128xf32>
    %c3 = arith.constant 3 : index
    %c0_33 = arith.constant 0 : index
    %c0_34 = arith.constant 0 : index
    %54 = vector.load %arg1[%c3, %c0_33, %c0_34] : memref<9x8x81xbf16, #tpu.memory_space<vmem>>, vector<1x8x81xbf16>
    %55 = vector.shape_cast %54 : vector<1x8x81xbf16> to vector<8x81xbf16>
    %cst_35 = arith.constant dense<0.000000e+00> : vector<8x288xf32>
    %56 = tpu.matmul %55, %6, %cst_35 {dimension_numbers = #tpu.dot_dimension_numbers<[1], [0], [0], [1], [0, 0, 1, 1], [], []>} : vector<8x81xbf16>, vector<81x288xbf16>, vector<8x288xf32> -> vector<8x288xf32>
    %57 = arith.addf %56, %2 : vector<8x288xf32>
    %cst_36 = arith.constant 0.000000e+00 : f32
    %58 = vector.broadcast %cst_36 : f32 to vector<8x288xf32>
    %59 = arith.maximumf %57, %58 : vector<8x288xf32>
    %60 = arith.truncf %59 : vector<8x288xf32> to vector<8x288xbf16>
    %cst_37 = arith.constant dense<0.000000e+00> : vector<8x64xf32>
    %61 = tpu.matmul %60, %7, %cst_37 {dimension_numbers = #tpu.dot_dimension_numbers<[1], [0], [0], [1], [0, 0, 1, 1], [], []>} : vector<8x288xbf16>, vector<288x64xbf16>, vector<8x64xf32> -> vector<8x64xf32>
    %62 = arith.addf %61, %5 : vector<8x64xf32>
    %cst_38 = arith.constant 0.000000e+00 : f32
    %63 = vector.broadcast %cst_38 : f32 to vector<8x64xf32>
    %64 = arith.maximumf %62, %63 : vector<8x64xf32>
    %65 = arith.truncf %64 : vector<8x64xf32> to vector<8x64xbf16>
    %c192 = arith.constant 192 : index
    %c0_39 = arith.constant 0 : index
    %66 = vector.load %arg6[%c192, %c0_39] : memref<576x128xbf16, #tpu.memory_space<vmem>>, vector<64x128xbf16>
    %cst_40 = arith.constant dense<0.000000e+00> : vector<8x128xf32>
    %67 = tpu.matmul %65, %66, %cst_40 {dimension_numbers = #tpu.dot_dimension_numbers<[1], [0], [0], [1], [0, 0, 1, 1], [], []>} : vector<8x64xbf16>, vector<64x128xbf16>, vector<8x128xf32> -> vector<8x128xf32>
    %68 = arith.addf %53, %67 : vector<8x128xf32>
    %c4 = arith.constant 4 : index
    %c0_41 = arith.constant 0 : index
    %c0_42 = arith.constant 0 : index
    %69 = vector.load %arg1[%c4, %c0_41, %c0_42] : memref<9x8x81xbf16, #tpu.memory_space<vmem>>, vector<1x8x81xbf16>
    %70 = vector.shape_cast %69 : vector<1x8x81xbf16> to vector<8x81xbf16>
    %cst_43 = arith.constant dense<0.000000e+00> : vector<8x288xf32>
    %71 = tpu.matmul %70, %6, %cst_43 {dimension_numbers = #tpu.dot_dimension_numbers<[1], [0], [0], [1], [0, 0, 1, 1], [], []>} : vector<8x81xbf16>, vector<81x288xbf16>, vector<8x288xf32> -> vector<8x288xf32>
    %72 = arith.addf %71, %2 : vector<8x288xf32>
    %cst_44 = arith.constant 0.000000e+00 : f32
    %73 = vector.broadcast %cst_44 : f32 to vector<8x288xf32>
    %74 = arith.maximumf %72, %73 : vector<8x288xf32>
    %75 = arith.truncf %74 : vector<8x288xf32> to vector<8x288xbf16>
    %cst_45 = arith.constant dense<0.000000e+00> : vector<8x64xf32>
    %76 = tpu.matmul %75, %7, %cst_45 {dimension_numbers = #tpu.dot_dimension_numbers<[1], [0], [0], [1], [0, 0, 1, 1], [], []>} : vector<8x288xbf16>, vector<288x64xbf16>, vector<8x64xf32> -> vector<8x64xf32>
    %77 = arith.addf %76, %5 : vector<8x64xf32>
    %cst_46 = arith.constant 0.000000e+00 : f32
    %78 = vector.broadcast %cst_46 : f32 to vector<8x64xf32>
    %79 = arith.maximumf %77, %78 : vector<8x64xf32>
    %80 = arith.truncf %79 : vector<8x64xf32> to vector<8x64xbf16>
    %c256 = arith.constant 256 : index
    %c0_47 = arith.constant 0 : index
    %81 = vector.load %arg6[%c256, %c0_47] : memref<576x128xbf16, #tpu.memory_space<vmem>>, vector<64x128xbf16>
    %cst_48 = arith.constant dense<0.000000e+00> : vector<8x128xf32>
    %82 = tpu.matmul %80, %81, %cst_48 {dimension_numbers = #tpu.dot_dimension_numbers<[1], [0], [0], [1], [0, 0, 1, 1], [], []>} : vector<8x64xbf16>, vector<64x128xbf16>, vector<8x128xf32> -> vector<8x128xf32>
    %83 = arith.addf %68, %82 : vector<8x128xf32>
    %c5 = arith.constant 5 : index
    %c0_49 = arith.constant 0 : index
    %c0_50 = arith.constant 0 : index
    %84 = vector.load %arg1[%c5, %c0_49, %c0_50] : memref<9x8x81xbf16, #tpu.memory_space<vmem>>, vector<1x8x81xbf16>
    %85 = vector.shape_cast %84 : vector<1x8x81xbf16> to vector<8x81xbf16>
    %cst_51 = arith.constant dense<0.000000e+00> : vector<8x288xf32>
    %86 = tpu.matmul %85, %6, %cst_51 {dimension_numbers = #tpu.dot_dimension_numbers<[1], [0], [0], [1], [0, 0, 1, 1], [], []>} : vector<8x81xbf16>, vector<81x288xbf16>, vector<8x288xf32> -> vector<8x288xf32>
    %87 = arith.addf %86, %2 : vector<8x288xf32>
    %cst_52 = arith.constant 0.000000e+00 : f32
    %88 = vector.broadcast %cst_52 : f32 to vector<8x288xf32>
    %89 = arith.maximumf %87, %88 : vector<8x288xf32>
    %90 = arith.truncf %89 : vector<8x288xf32> to vector<8x288xbf16>
    %cst_53 = arith.constant dense<0.000000e+00> : vector<8x64xf32>
    %91 = tpu.matmul %90, %7, %cst_53 {dimension_numbers = #tpu.dot_dimension_numbers<[1], [0], [0], [1], [0, 0, 1, 1], [], []>} : vector<8x288xbf16>, vector<288x64xbf16>, vector<8x64xf32> -> vector<8x64xf32>
    %92 = arith.addf %91, %5 : vector<8x64xf32>
    %cst_54 = arith.constant 0.000000e+00 : f32
    %93 = vector.broadcast %cst_54 : f32 to vector<8x64xf32>
    %94 = arith.maximumf %92, %93 : vector<8x64xf32>
    %95 = arith.truncf %94 : vector<8x64xf32> to vector<8x64xbf16>
    %c320 = arith.constant 320 : index
    %c0_55 = arith.constant 0 : index
    %96 = vector.load %arg6[%c320, %c0_55] : memref<576x128xbf16, #tpu.memory_space<vmem>>, vector<64x128xbf16>
    %cst_56 = arith.constant dense<0.000000e+00> : vector<8x128xf32>
    %97 = tpu.matmul %95, %96, %cst_56 {dimension_numbers = #tpu.dot_dimension_numbers<[1], [0], [0], [1], [0, 0, 1, 1], [], []>} : vector<8x64xbf16>, vector<64x128xbf16>, vector<8x128xf32> -> vector<8x128xf32>
    %98 = arith.addf %83, %97 : vector<8x128xf32>
    %c6 = arith.constant 6 : index
    %c0_57 = arith.constant 0 : index
    %c0_58 = arith.constant 0 : index
    %99 = vector.load %arg1[%c6, %c0_57, %c0_58] : memref<9x8x81xbf16, #tpu.memory_space<vmem>>, vector<1x8x81xbf16>
    %100 = vector.shape_cast %99 : vector<1x8x81xbf16> to vector<8x81xbf16>
    %cst_59 = arith.constant dense<0.000000e+00> : vector<8x288xf32>
    %101 = tpu.matmul %100, %6, %cst_59 {dimension_numbers = #tpu.dot_dimension_numbers<[1], [0], [0], [1], [0, 0, 1, 1], [], []>} : vector<8x81xbf16>, vector<81x288xbf16>, vector<8x288xf32> -> vector<8x288xf32>
    %102 = arith.addf %101, %2 : vector<8x288xf32>
    %cst_60 = arith.constant 0.000000e+00 : f32
    %103 = vector.broadcast %cst_60 : f32 to vector<8x288xf32>
    %104 = arith.maximumf %102, %103 : vector<8x288xf32>
    %105 = arith.truncf %104 : vector<8x288xf32> to vector<8x288xbf16>
    %cst_61 = arith.constant dense<0.000000e+00> : vector<8x64xf32>
    %106 = tpu.matmul %105, %7, %cst_61 {dimension_numbers = #tpu.dot_dimension_numbers<[1], [0], [0], [1], [0, 0, 1, 1], [], []>} : vector<8x288xbf16>, vector<288x64xbf16>, vector<8x64xf32> -> vector<8x64xf32>
    %107 = arith.addf %106, %5 : vector<8x64xf32>
    %cst_62 = arith.constant 0.000000e+00 : f32
    %108 = vector.broadcast %cst_62 : f32 to vector<8x64xf32>
    %109 = arith.maximumf %107, %108 : vector<8x64xf32>
    %110 = arith.truncf %109 : vector<8x64xf32> to vector<8x64xbf16>
    %c384 = arith.constant 384 : index
    %c0_63 = arith.constant 0 : index
    %111 = vector.load %arg6[%c384, %c0_63] : memref<576x128xbf16, #tpu.memory_space<vmem>>, vector<64x128xbf16>
    %cst_64 = arith.constant dense<0.000000e+00> : vector<8x128xf32>
    %112 = tpu.matmul %110, %111, %cst_64 {dimension_numbers = #tpu.dot_dimension_numbers<[1], [0], [0], [1], [0, 0, 1, 1], [], []>} : vector<8x64xbf16>, vector<64x128xbf16>, vector<8x128xf32> -> vector<8x128xf32>
    %113 = arith.addf %98, %112 : vector<8x128xf32>
    %c7 = arith.constant 7 : index
    %c0_65 = arith.constant 0 : index
    %c0_66 = arith.constant 0 : index
    %114 = vector.load %arg1[%c7, %c0_65, %c0_66] : memref<9x8x81xbf16, #tpu.memory_space<vmem>>, vector<1x8x81xbf16>
    %115 = vector.shape_cast %114 : vector<1x8x81xbf16> to vector<8x81xbf16>
    %cst_67 = arith.constant dense<0.000000e+00> : vector<8x288xf32>
    %116 = tpu.matmul %115, %6, %cst_67 {dimension_numbers = #tpu.dot_dimension_numbers<[1], [0], [0], [1], [0, 0, 1, 1], [], []>} : vector<8x81xbf16>, vector<81x288xbf16>, vector<8x288xf32> -> vector<8x288xf32>
    %117 = arith.addf %116, %2 : vector<8x288xf32>
    %cst_68 = arith.constant 0.000000e+00 : f32
    %118 = vector.broadcast %cst_68 : f32 to vector<8x288xf32>
    %119 = arith.maximumf %117, %118 : vector<8x288xf32>
    %120 = arith.truncf %119 : vector<8x288xf32> to vector<8x288xbf16>
    %cst_69 = arith.constant dense<0.000000e+00> : vector<8x64xf32>
    %121 = tpu.matmul %120, %7, %cst_69 {dimension_numbers = #tpu.dot_dimension_numbers<[1], [0], [0], [1], [0, 0, 1, 1], [], []>} : vector<8x288xbf16>, vector<288x64xbf16>, vector<8x64xf32> -> vector<8x64xf32>
    %122 = arith.addf %121, %5 : vector<8x64xf32>
    %cst_70 = arith.constant 0.000000e+00 : f32
    %123 = vector.broadcast %cst_70 : f32 to vector<8x64xf32>
    %124 = arith.maximumf %122, %123 : vector<8x64xf32>
    %125 = arith.truncf %124 : vector<8x64xf32> to vector<8x64xbf16>
    %c448 = arith.constant 448 : index
    %c0_71 = arith.constant 0 : index
    %126 = vector.load %arg6[%c448, %c0_71] : memref<576x128xbf16, #tpu.memory_space<vmem>>, vector<64x128xbf16>
    %cst_72 = arith.constant dense<0.000000e+00> : vector<8x128xf32>
    %127 = tpu.matmul %125, %126, %cst_72 {dimension_numbers = #tpu.dot_dimension_numbers<[1], [0], [0], [1], [0, 0, 1, 1], [], []>} : vector<8x64xbf16>, vector<64x128xbf16>, vector<8x128xf32> -> vector<8x128xf32>
    %128 = arith.addf %113, %127 : vector<8x128xf32>
    %c8 = arith.constant 8 : index
    %c0_73 = arith.constant 0 : index
    %c0_74 = arith.constant 0 : index
    %129 = vector.load %arg1[%c8, %c0_73, %c0_74] : memref<9x8x81xbf16, #tpu.memory_space<vmem>>, vector<1x8x81xbf16>
    %130 = vector.shape_cast %129 : vector<1x8x81xbf16> to vector<8x81xbf16>
    %cst_75 = arith.constant dense<0.000000e+00> : vector<8x288xf32>
    %131 = tpu.matmul %130, %6, %cst_75 {dimension_numbers = #tpu.dot_dimension_numbers<[1], [0], [0], [1], [0, 0, 1, 1], [], []>} : vector<8x81xbf16>, vector<81x288xbf16>, vector<8x288xf32> -> vector<8x288xf32>
    %132 = arith.addf %131, %2 : vector<8x288xf32>
    %cst_76 = arith.constant 0.000000e+00 : f32
    %133 = vector.broadcast %cst_76 : f32 to vector<8x288xf32>
    %134 = arith.maximumf %132, %133 : vector<8x288xf32>
    %135 = arith.truncf %134 : vector<8x288xf32> to vector<8x288xbf16>
    %cst_77 = arith.constant dense<0.000000e+00> : vector<8x64xf32>
    %136 = tpu.matmul %135, %7, %cst_77 {dimension_numbers = #tpu.dot_dimension_numbers<[1], [0], [0], [1], [0, 0, 1, 1], [], []>} : vector<8x288xbf16>, vector<288x64xbf16>, vector<8x64xf32> -> vector<8x64xf32>
    %137 = arith.addf %136, %5 : vector<8x64xf32>
    %cst_78 = arith.constant 0.000000e+00 : f32
    %138 = vector.broadcast %cst_78 : f32 to vector<8x64xf32>
    %139 = arith.maximumf %137, %138 : vector<8x64xf32>
    %140 = arith.truncf %139 : vector<8x64xf32> to vector<8x64xbf16>
    %c512 = arith.constant 512 : index
    %c0_79 = arith.constant 0 : index
    %141 = vector.load %arg6[%c512, %c0_79] : memref<576x128xbf16, #tpu.memory_space<vmem>>, vector<64x128xbf16>
    %cst_80 = arith.constant dense<0.000000e+00> : vector<8x128xf32>
    %142 = tpu.matmul %140, %141, %cst_80 {dimension_numbers = #tpu.dot_dimension_numbers<[1], [0], [0], [1], [0, 0, 1, 1], [], []>} : vector<8x64xbf16>, vector<64x128xbf16>, vector<8x128xf32> -> vector<8x128xf32>
    %143 = arith.addf %128, %142 : vector<8x128xf32>
    %c0_81 = arith.constant 0 : index
    %c0_82 = arith.constant 0 : index
    %144 = vector.load %arg7[%c0_81, %c0_82] : memref<1x128xf32, #tpu.memory_space<vmem>>, vector<1x128xf32>
    %145 = vector.broadcast %144 : vector<1x128xf32> to vector<8x128xf32>
    %146 = arith.addf %143, %145 : vector<8x128xf32>
    %cst_83 = arith.constant 0.000000e+00 : f32
    %147 = vector.broadcast %cst_83 : f32 to vector<8x128xf32>
    %148 = arith.maximumf %146, %147 : vector<8x128xf32>
    %149 = arith.truncf %148 : vector<8x128xf32> to vector<8x128xbf16>
    %c0_84 = arith.constant 0 : index
    %c0_85 = arith.constant 0 : index
    %150 = vector.load %arg8[%c0_84, %c0_85] : memref<128x256xbf16, #tpu.memory_space<vmem>>, vector<128x256xbf16>
    %cst_86 = arith.constant dense<0.000000e+00> : vector<8x256xf32>
    %151 = tpu.matmul %149, %150, %cst_86 {dimension_numbers = #tpu.dot_dimension_numbers<[1], [0], [0], [1], [0, 0, 1, 1], [], []>} : vector<8x128xbf16>, vector<128x256xbf16>, vector<8x256xf32> -> vector<8x256xf32>
    %c0_87 = arith.constant 0 : index
    %c0_88 = arith.constant 0 : index
    %152 = vector.load %arg9[%c0_87, %c0_88] : memref<1x256xf32, #tpu.memory_space<vmem>>, vector<1x256xf32>
    %153 = vector.broadcast %152 : vector<1x256xf32> to vector<8x256xf32>
    %154 = arith.addf %151, %153 : vector<8x256xf32>
    %cst_89 = arith.constant 0.000000e+00 : f32
    %155 = vector.broadcast %cst_89 : f32 to vector<8x256xf32>
    %156 = arith.maximumf %154, %155 : vector<8x256xf32>
    %157 = arith.truncf %156 : vector<8x256xf32> to vector<8x256xbf16>
    %c0_90 = arith.constant 0 : index
    %c0_91 = arith.constant 0 : index
    %158 = vector.load %arg10[%c0_90, %c0_91] : memref<256x128xbf16, #tpu.memory_space<vmem>>, vector<256x128xbf16>
    %cst_92 = arith.constant dense<0.000000e+00> : vector<8x128xf32>
    %159 = tpu.matmul %157, %158, %cst_92 {dimension_numbers = #tpu.dot_dimension_numbers<[1], [0], [0], [1], [0, 0, 1, 1], [], []>} : vector<8x256xbf16>, vector<256x128xbf16>, vector<8x128xf32> -> vector<8x128xf32>
    %c0_93 = arith.constant 0 : index
    %c0_94 = arith.constant 0 : index
    %160 = vector.load %arg11[%c0_93, %c0_94] : memref<1x128xf32, #tpu.memory_space<vmem>>, vector<1x128xf32>
    %161 = vector.broadcast %160 : vector<1x128xf32> to vector<8x128xf32>
    %162 = arith.addf %159, %161 : vector<8x128xf32>
    %c0_95 = arith.constant 0 : index
    %c0_96 = arith.constant 0 : index
    %163 = vector.load %arg12[%c0_95, %c0_96] : memref<8x128xf32, #tpu.memory_space<vmem>>, vector<8x128xf32>
    tpu.vector_store %arg12[%c0_95, %c0_96], %162 {strides = array<i32>} : memref<8x128xf32, #tpu.memory_space<vmem>>, vector<8x128xf32>,
    return
  }
  func.func @transform_0(%arg0: i32) -> (i32, i32, i32) {
    %c0_i32 = arith.constant 0 : i32
    %c0_i32_0 = arith.constant 0 : i32
    %c0_i32_1 = arith.constant 0 : i32
    return %c0_i32, %arg0, %c0_i32_0 : i32, i32, i32
  }
  func.func @transform_1(%arg0: i32) -> (i32, i32) {
    %c0_i32 = arith.constant 0 : i32
    %c0_i32_0 = arith.constant 0 : i32
    %c0_i32_1 = arith.constant 0 : i32
    return %c0_i32, %c0_i32_0 : i32, i32
  }
  func.func @transform_2(%arg0: i32) -> (i32, i32) {
    %c0_i32 = arith.constant 0 : i32
    %c0_i32_0 = arith.constant 0 : i32
    %c0_i32_1 = arith.constant 0 : i32
    return %c0_i32, %c0_i32_0 : i32, i32
  }
  func.func @transform_3(%arg0: i32) -> (i32, i32) {
    %c0_i32 = arith.constant 0 : i32
    %c0_i32_0 = arith.constant 0 : i32
    %c0_i32_1 = arith.constant 0 : i32
    return %c0_i32, %c0_i32_0 : i32, i32
  }
  func.func @transform_4(%arg0: i32) -> (i32, i32) {
    %c0_i32 = arith.constant 0 : i32
    %c0_i32_0 = arith.constant 0 : i32
    %c0_i32_1 = arith.constant 0 : i32
    return %c0_i32, %c0_i32_0 : i32, i32
  }
  func.func @transform_5(%arg0: i32) -> (i32, i32) {
    %c0_i32 = arith.constant 0 : i32
    %c0_i32_0 = arith.constant 0 : i32
    %c0_i32_1 = arith.constant 0 : i32
    return %c0_i32, %c0_i32_0 : i32, i32
  }
  func.func @transform_6(%arg0: i32) -> (i32, i32) {
    %c0_i32 = arith.constant 0 : i32
    %c0_i32_0 = arith.constant 0 : i32
    %c0_i32_1 = arith.constant 0 : i32
    return %c0_i32, %c0_i32_0 : i32, i32
  }
  func.func @transform_7(%arg0: i32) -> (i32, i32) {
    %c0_i32 = arith.constant 0 : i32
    %c0_i32_0 = arith.constant 0 : i32
    %c0_i32_1 = arith.constant 0 : i32
    return %c0_i32, %c0_i32_0 : i32, i32
  }
  func.func @transform_8(%arg0: i32) -> (i32, i32) {
    %c0_i32 = arith.constant 0 : i32
    %c0_i32_0 = arith.constant 0 : i32
    %c0_i32_1 = arith.constant 0 : i32
    return %c0_i32, %c0_i32_0 : i32, i32
  }
  func.func @transform_9(%arg0: i32) -> (i32, i32) {
    %c0_i32 = arith.constant 0 : i32
    %c0_i32_0 = arith.constant 0 : i32
    %c0_i32_1 = arith.constant 0 : i32
    return %c0_i32, %c0_i32_0 : i32, i32
  }
  func.func @transform_10(%arg0: i32) -> (i32, i32) {
    %c0_i32 = arith.constant 0 : i32
    %c0_i32_0 = arith.constant 0 : i32
    %c0_i32_1 = arith.constant 0 : i32
    return %c0_i32, %c0_i32_0 : i32, i32
  }
  func.func @transform_11(%arg0: i32) -> (i32, i32) {
    %c0_i32 = arith.constant 0 : i32
    %c0_i32_0 = arith.constant 0 : i32
    return %arg0, %c0_i32 : i32, i32
  }
}

</mosaic_0001>

<bundles_post_ra>
// kernel: dqn_forward.1
= control target key start
LH: loop header
LB: loop body
LE: loop exit
PB: predicated region body
PF: predicated region fallthrough
CT: control target
= control target key end

     0   :  { %vm214_vm0 = vcmask 1040384   ;;  %v3933_v0 = vmov 0.0   ;;  %v3934_v2 = vmov 0   ;;  %vm3935_vm1 = vmmov 0   ;;  %s5206_s1 = inlined_call_operand.vmem [shape: bf16[81,288], index: 1, kind: input, shape index: {}]   ;;  %s5207_s3 = inlined_call_operand.vmem [shape: bf16[288,64], index: 3, kind: input, shape index: {}]   ;;  %s5208_s0 = inlined_call_operand.vmem [shape: bf16[9,8,81], index: 0, kind: input, shape index: {}]   ;;  %s5209_s2 = inlined_call_operand.vmem [shape: f32[1,288], index: 2, kind: input, shape index: {}]   ;;  %s5210_s5 = inlined_call_operand.vmem [shape: bf16[576,128], index: 5, kind: input, shape index: {}]   ;;  %s5211_s4 = inlined_call_operand.vmem [shape: f32[1,64], index: 4, kind: input, shape index: {}]   ;;  %s5212_s7 = inlined_call_operand.vmem [shape: bf16[128,256], index: 7, kind: input, shape index: {}]   ;;  %s5213_s9 = inlined_call_operand.vmem [shape: bf16[256,128], index: 9, kind: input, shape index: {}]   ;;  %s5214_s6 = inlined_call_operand.vmem [shape: f32[1,128], index: 6, kind: input, shape index: {}]   ;;  %s5215_s8 = inlined_call_operand.vmem [shape: f32[1,256], index: 8, kind: input, shape index: {}]   ;;  %s5216_s10 = inlined_call_operand.vmem [shape: f32[1,128], index: 10, kind: input, shape index: {}]   ;;  %s5217_s11 = inlined_call_operand.vmem [shape: f32[8,128], index: 11, kind: output, shape index: {}]  }
   0x1   :  { %3455 = vmatprep.subr.bf16.mxu1 %v3933_v0  ;;  %v83_v1 = vld [vmem:[%s5206_s1 + $0x78] sm:$0x11]  ;;  %v216_v3 = vsel %vm214_vm0, 65535, %v3934_v2  ;;  %3467 = vmatprep.mubr.msk.bf16.mxu1 %vm3935_vm1, %v3933_v0  ;;  %v3783_v5 = vld [vmem:[%s5206_s1 + $0x80] ss:$0 sps:$4 sm:$0x11]   ;;  %v41_v44 = vlaneseq }
   0x2   :  { %v2966_v4 = vcombine.high %v83_v1, %v83_v1  ;;  %v2965_v6 = vcombine.low %v83_v1, %v83_v1  ;;  %258 = vmatprep.mubr.bf16.mxu0 %v3934_v2  ;;  %v4009_v8 = vand.u32 %v3783_v5, %v216_v3  ;;  %v4016_v10 = vld [vmem:[%s5206_s1 + $0x64] ss:$12 sps:$4 sm:$0xff]   ;;  %v4023_v11 = vld [vmem:[%s5206_s1 + $0x68] ss:$12 sps:$4 sm:$0xff]   ;;  %v4030_v12 = vld [vmem:[%s5206_s1 + $0x60] ss:$12 sps:$4 sm:$0xff]  }
   0x3   :  { %v4036_v13 = vld [vmem:[%s5206_s1 + $0x4c] ss:$12 sps:$4 sm:$0xff]   ;;  %v4042_v14 = vld [vmem:[%s5206_s1 + $0x50] ss:$12 sps:$4 sm:$0xff]   ;;  %v4049_v15 = vld [vmem:[%s5206_s1 + $0x48] ss:$12 sps:$4 sm:$0xff]  }
   0x4   :  { %v4007_v7 = vand.u32 %v2966_v4, %v216_v3  ;;  %v4011_v9 = vand.u32 %v2965_v6, %v216_v3  ;;  %3456 = vmatpush3.bf16.msra.mxu1 %v4009_v8  ;;  %v4055_v16 = vld [vmem:[%s5206_s1 + $0x34] ss:$12 sps:$4 sm:$0xff]   ;;  %v4061_v17 = vld [vmem:[%s5206_s1 + $0x38] ss:$12 sps:$4 sm:$0xff]   ;;  %v4068_v18 = vld [vmem:[%s5206_s1 + $0x30] ss:$12 sps:$4 sm:$0xff]  }
   0x5   :  { %3457 = vmatprep.subr.bf16.mxu1 %v3933_v0  ;;  %v4074_v19 = vld [vmem:[%s5206_s1 + $0x1c] ss:$12 sps:$4 sm:$0xff]   ;;  %v4080_v20 = vld [vmem:[%s5206_s1 + $0x20] ss:$12 sps:$4 sm:$0xff]   ;;  %v4087_v21 = vld [vmem:[%s5206_s1 + $0x18] ss:$12 sps:$4 sm:$0xff]  }
   0x6   :  { %230 = vmatprep.subr.bf16.mxu0 %v4007_v7  ;;  %v4093_v22 = vld [vmem:[%s5206_s1 + $0x4] ss:$12 sps:$4 sm:$0xff]   ;;  %v4099_v23 = vld [vmem:[%s5206_s1 + $0x8] ss:$12 sps:$4 sm:$0xff]   ;;  %v4106_v24 = vld [vmem:[%s5206_s1] ss:$12 sps:$4 sm:$0xff]  }
   0x7   :  { %231 = vmatpush1.bf16.msra.mxu0 %v4011_v9  ;;  %v121_v25 = vld [vmem:[%s5208_s0] sm:$0xf]  ;;  %v4115_v26 = vld [vmem:[%s5207_s3 + $0x78] sm:$0xff]   ;;  %vm210_vm2 = vcmask 662528   ;;  %v4126_v28 = vld [vmem:[%s5207_s3 + $0x88] sm:$0xff]   ;;  %v4230_v45 = vshrl.u32 %v41_v44, 7 }
   0x8   :  { %232 = vmatprep.subr.bf16.mxu0 %v4016_v10  ;;  %3458 = vmatpush3.bf16.msra.mxu1 %v4023_v11  ;;  %v4120_v27 = vld [vmem:[%s5207_s3 + $0x38] sm:$0xff]   ;;  %v4132_v29 = vld [vmem:[%s5207_s3 + $0x70] sm:$0xff]   ;;  %v4150_v31 = vld [vmem:[%s5207_s3 + $0x68] sm:$0xff]   ;;  %vm421_vm3 = vcmask 261120   ;;  %vm724_vm4 = vcmask 523264  }
   0x9   :  { %3459 = vmatprep.subr.bf16.mxu1 %v3933_v0  ;;  %v4143_v30 = vld [vmem:[%s5207_s3 + $0x30] sm:$0xff]   ;;  %v4158_v32 = vld [vmem:[%s5207_s3 + $0x28] sm:$0xff]   ;;  %v4164_v33 = vld [vmem:[%s5207_s3 + $0x60] sm:$0xff]   ;;  %v51_v46 = vsub.s32 2, %v4230_v45  ;;  %v43_v48 = vsub.s32 0, %v4230_v45  ;;  %v47_v49 = vsub.s32 1, %v4230_v45 }
   0xa   :  { %v4170_v34 = vld [vmem:[%s5207_s3 + $0x20] sm:$0xff]   ;;  %v4176_v35 = vld [vmem:[%s5207_s3 + $0x58] sm:$0xff]   ;;  %v4188_v37 = vld [vmem:[%s5207_s3 + $0x50] sm:$0xff]  }
   0xb   :  { %233 = vmatpush1.bf16.msra.mxu0 %v4030_v12  ;;  %v4182_v36 = vld [vmem:[%s5207_s3 + $0x18] sm:$0xff]   ;;  %v4194_v38 = vld [vmem:[%s5207_s3 + $0x10] sm:$0xff]   ;;  %v4201_v39 = vld [vmem:[%s5207_s3 + $0x48] sm:$0xff]  }
   0xc   :  { %234 = vmatprep.subr.bf16.mxu0 %v4036_v13  ;;  %3460 = vmatpush3.bf16.msra.mxu1 %v4042_v14  ;;  %v4206_v40 = vld [vmem:[%s5207_s3 + $0x80] sm:$0xff]   ;;  %v4211_v41 = vld [vmem:[%s5207_s3 + $0x8] sm:$0xff]  }
   0xd   :  { %3461 = vmatprep.subr.bf16.mxu1 %v3933_v0  ;;  %v4220_v42 = vld [vmem:[%s5207_s3 + $0x40] sm:$0xff]  }
   0xe   :  { %v4225_v43 = vld [vmem:[%s5207_s3] sm:$0xff]  }
   0xf   :  { %235 = vmatpush1.bf16.msra.mxu0 %v4049_v15  ;;  %v39_v47 = vld [vmem:[%s5209_s2] sm:$0x7]  ;;  %v2989_v44 = vld [vmem:[%s5208_s0 + $0x4] sm:$0xf] }
  0x10   :  { %236 = vmatprep.subr.bf16.mxu0 %v4055_v16  ;;  %3462 = vmatpush3.bf16.msra.mxu1 %v4061_v17  ;;  %v4238_v50 = vrot.slane %v39_v47, %v51_v46  ;;  %v4242_v51 = vrot.slane %v39_v47, %v43_v48  ;;  %v4246_v53 = vrot.slane %v39_v47, %v47_v49 }
  0x11   :  { %3463 = vmatprep.subr.bf16.mxu1 %v3933_v0 }
  0x13   :  { %237 = vmatpush1.bf16.msra.mxu0 %v4068_v18 }
  0x14   :  { %238 = vmatprep.subr.bf16.mxu0 %v4074_v19  ;;  %3464 = vmatpush3.bf16.msra.mxu1 %v4080_v20 }
  0x15   :  { %3465 = vmatprep.subr.bf16.mxu1 %v3933_v0 }
  0x17   :  { %239 = vmatpush1.bf16.msra.mxu0 %v4087_v21 }
  0x18   :  { %240 = vmatprep.subr.bf16.mxu0 %v4093_v22  ;;  %3466 = vmatpush3.bf16.msra.mxu1 %v4099_v23 }
  0x19   :  { %3471 = vmatprep.subr.bf16.mxu1 %v3933_v0 }
  0x1b   :  { %241 = vmatpush1.bf16.msra.mxu0 %v4106_v24  ;;  %3468 = vmatmul.mubr.msk.bf16.vlgmr.msra.gmra.mxu1 %vm210_vm2, %v121_v25 }
  0x1c   :  { %3107 = vmatprep.subr.bf16.mxu0 %v4115_v26  ;;  %3472 = vmatpush3.bf16.msra.mxu1 %v4126_v28 }
  0x1d   :  { %3473 = vmatprep.subr.bf16.mxu1 %v3933_v0  ;;  %3475 = vmatprep.mubr.msk.bf16.mxu1 %vm3935_vm1, %v3933_v0 }
  0x1e   :  { %2968 = vmatmul.mubr.msk.bf16.vlgmr.msra.gmra.mxu0 %vm210_vm2, %v121_v25 }
  0x1f   :  { %3108 = vmatpush3.bf16.msra.mxu0 %v4120_v27 }
  0x20   :  { %3109 = vmatprep.subr.bf16.mxu0 %v4132_v29  ;;  %3474 = vmatpush3.bf16.msra.mxu1 %v4206_v40 }
  0x21   :  { %524 = vmatprep.subr.bf16.mxu1 %v4007_v7 }
  0x23   :  { %3110 = vmatpush3.bf16.msra.mxu0 %v4143_v30 }
  0x24   :  { %3111 = vmatprep.subr.bf16.mxu0 %v4150_v31 }
  0x27   :  { %3112 = vmatpush3.bf16.msra.mxu0 %v4158_v32 }
  0x28   :  { %3113 = vmatprep.subr.bf16.mxu0 %v4164_v33 }
  0x2b   :  { %3114 = vmatpush3.bf16.msra.mxu0 %v4170_v34 }
  0x2c   :  { %3115 = vmatprep.subr.bf16.mxu0 %v4176_v35 }
  0x2f   :  { %3116 = vmatpush3.bf16.msra.mxu0 %v4182_v36 }
  0x30   :  { %3117 = vmatprep.subr.bf16.mxu0 %v4188_v37 }
  0x33   :  { %3118 = vmatpush3.bf16.msra.mxu0 %v4194_v38 }
  0x34   :  { %3119 = vmatprep.subr.bf16.mxu0 %v4201_v39 }
  0x37   :  { %3120 = vmatpush3.bf16.msra.mxu0 %v4211_v41 }
  0x38   :  { %3121 = vmatprep.subr.bf16.mxu0 %v4220_v42 }
  0x3b   :  { %3122 = vmatpush3.bf16.msra.mxu0 %v4225_v43 }
  0x3c   :  { %3479 = vmatprep.subr.bf16.mxu0 %v3933_v0 }
  0xdb   :  { %v301_v52 = vpop.f32.mrf.mxu1 }
  0xdc   :  { %v302_v54 = vadd.f32 %v301_v52, %v4238_v50 }
  0xdd   :  { %v3469_v57 = vpop.f32.mrf.mxu1 }
  0xde   :  { %v260_v55 = vpop.f32.mrf.mxu0  ;;  %v309_v58 = vmax.f32 %v302_v54, 0.0 }
  0xdf   :  { %v261_v56 = vadd.f32 %v260_v55, %v4242_v51  ;;  %v304_v62 = vpop.f32.mrf.mxu1 }
  0xe0   :  { %v262_v59 = vpop.f32.mrf.mxu0  ;;  %v312_v63 = vpack.c.bf16 %v309_v58, %v309_v58 }
  0xe1   :  { %v307_v60 = vmax.f32 %v261_v56, 0.0  ;;  %v263_v61 = vadd.f32 %v262_v59, %v4246_v53  ;;  %v3470_v4 = vpop.f32.mrf.mxu1 }
  0xe2   :  { %v264_v1 = vpop.f32.mrf.mxu0  ;;  %3476 = vmatmul.mubr.msk.bf16.vlgmr.msra.gmra.mxu1 %vm421_vm3, %v312_v63 }
  0xe3   :  { %v308_v3 = vmax.f32 %v263_v61, 0.0  ;;  %v310_v5 = vpack.c.bf16 %v307_v60, %v307_v60  ;;  %525 = vmatpush1.bf16.msra.mxu1 %v4011_v9  ;;  %552 = vmatprep.mubr.bf16.mxu1 %v3934_v2 }
  0xe4   :  { %v265_v6 = vpop.f32.mrf.mxu0  ;;  %526 = vmatprep.subr.bf16.mxu1 %v4016_v10 }
  0xe5   :  { %v311_v25 = vpack.c.bf16 %v308_v3, %v308_v3 }
  0xe7   :  { %457 = vmatprep.mubr.bf16.mxu0 %v311_v25  ;;  %527 = vmatpush1.bf16.msra.mxu1 %v4030_v12 }
  0xe8   :  { %458 = vmatmul.mubr.bf16.vlgmr.msra.gmra.mxu0 %v310_v5  ;;  %528 = vmatprep.subr.bf16.mxu1 %v4036_v13 }
  0xe9   :  { %3480 = vmatpush3.bf16.msra.mxu0 %v4009_v8  ;;  %3491 = vmatprep.mubr.msk.bf16.mxu0 %vm3935_vm1, %v3933_v0 }
  0xea   :  { %3481 = vmatprep.subr.bf16.mxu0 %v3933_v0 }
  0xeb   :  { %529 = vmatpush1.bf16.msra.mxu1 %v4049_v15 }
  0xec   :  { %530 = vmatprep.subr.bf16.mxu1 %v4055_v16 }
  0xed   :  { %3482 = vmatpush3.bf16.msra.mxu0 %v4023_v11 }
  0xee   :  { %3483 = vmatprep.subr.bf16.mxu0 %v3933_v0 }
  0xef   :  { %531 = vmatpush1.bf16.msra.mxu1 %v4068_v18 }
  0xf0   :  { %532 = vmatprep.subr.bf16.mxu1 %v4074_v19 }
  0xf1   :  { %3484 = vmatpush3.bf16.msra.mxu0 %v4042_v14 }
  0xf2   :  { %3485 = vmatprep.subr.bf16.mxu0 %v3933_v0 }
  0xf3   :  { %533 = vmatpush1.bf16.msra.mxu1 %v4087_v21 }
  0xf4   :  { %534 = vmatprep.subr.bf16.mxu1 %v4093_v22 }
  0xf5   :  { %3486 = vmatpush3.bf16.msra.mxu0 %v4061_v17 }
  0xf6   :  { %3487 = vmatprep.subr.bf16.mxu0 %v3933_v0 }
  0xf7   :  { %535 = vmatpush1.bf16.msra.mxu1 %v4106_v24 }
  0xf8   :  { %3139 = vmatprep.subr.bf16.mxu1 %v4115_v26 }
  0xf9   :  { %3488 = vmatpush3.bf16.msra.mxu0 %v4080_v20 }
  0xfa   :  { %3489 = vmatprep.subr.bf16.mxu0 %v3933_v0  ;;  %2990 = vmatmul.mubr.msk.bf16.vlgmr.msra.gmra.mxu1 %vm210_vm2, %v2989_v44 }
  0xfb   :  { %3140 = vmatpush3.bf16.msra.mxu1 %v4120_v27 }
  0xfc   :  { %3141 = vmatprep.subr.bf16.mxu1 %v4132_v29 }
  0xfd   :  { %3490 = vmatpush3.bf16.msra.mxu0 %v4099_v23 }
  0xfe   :  { %3495 = vmatprep.subr.bf16.mxu0 %v3933_v0 }
  0xff   :  { %3142 = vmatpush3.bf16.msra.mxu1 %v4143_v30 }
 0x100   :  { %3492 = vmatmul.mubr.msk.bf16.vlgmr.msra.gmra.mxu0 %vm210_vm2, %v2989_v44  ;;  %3143 = vmatprep.subr.bf16.mxu1 %v4150_v31 }
 0x101   :  { %3496 = vmatpush3.bf16.msra.mxu0 %v4126_v28  ;;  %3499 = vmatprep.mubr.msk.bf16.mxu0 %vm3935_vm1, %v3933_v0 }
 0x102   :  { %3497 = vmatprep.subr.bf16.mxu0 %v3933_v0 }
 0x103   :  { %3144 = vmatpush3.bf16.msra.mxu1 %v4158_v32 }
 0x104   :  { %3145 = vmatprep.subr.bf16.mxu1 %v4164_v33 }
 0x105   :  { %3498 = vmatpush3.bf16.msra.mxu0 %v4206_v40 }
 0x106   :  { %3503 = vmatprep.subr.bf16.mxu0 %v3933_v0 }
 0x107   :  { %3146 = vmatpush3.bf16.msra.mxu1 %v4170_v34 }
 0x108   :  { %3147 = vmatprep.subr.bf16.mxu1 %v4176_v35 }
 0x10b   :  { %3148 = vmatpush3.bf16.msra.mxu1 %v4182_v36 }
 0x10c   :  { %3149 = vmatprep.subr.bf16.mxu1 %v4188_v37 }
 0x10f   :  { %3150 = vmatpush3.bf16.msra.mxu1 %v4194_v38 }
 0x110   :  { %3151 = vmatprep.subr.bf16.mxu1 %v4201_v39 }
 0x113   :  { %3152 = vmatpush3.bf16.msra.mxu1 %v4211_v41 }
 0x114   :  { %3153 = vmatprep.subr.bf16.mxu1 %v4220_v42 }
 0x117   :  { %3154 = vmatpush3.bf16.msra.mxu1 %v4225_v43 }
 0x118   :  { %3515 = vmatprep.subr.bf16.mxu1 %v3933_v0 }
 0x1a2   :  { %v499_v46 = vpop.f32.mrf.mxu1 }
 0x1a4   :  { %v3477_v47 = vpop.f32.mrf.mxu1 }
 0x1a6   :  { %v502_v54 = vpop.f32.mrf.mxu1 }
 0x1a7   :  { %v3823_v54 = vld [vmem:[%s5210_s5 + $0x18] sm:$0xff]  }
 0x1a8   :  { %v3123_v52 = vpop.f32.mrf.mxu0  ;;  %v3478_v56 = vpop.f32.mrf.mxu1 }
 0x1aa   :  { %v3124_v55 = vpop.f32.mrf.mxu0 }
 0x1ab   :  { %v3125_v56 = vadd.f32 %v3124_v55, %v3123_v52  ;;  %v3824_v52 = vld [vmem:[%s5210_s5 + $0x10] sm:$0xff]  }
 0x1ac   :  { %v3126_v57 = vpop.f32.mrf.mxu0 }
 0x1ae   :  { %v3127_v58 = vpop.f32.mrf.mxu0 }
 0x1ba   :  { %v554_v59 = vpop.f32.mrf.mxu1 }
 0x1bb   :  { %v555_v60 = vadd.f32 %v554_v59, %v4242_v51  ;;  %v4315_v59 = vld [vmem:[%s5211_s4] ss:$0 sm:$0xff] }
 0x1bc   :  { %v556_v61 = vpop.f32.mrf.mxu1  ;;  %v460_v55 = vadd.f32 %v3125_v56, %v4315_v59 }
 0x1bd   :  { %v557_v62 = vadd.f32 %v556_v61, %v4246_v53  ;;  %v601_v63 = vmax.f32 %v555_v60, 0.0  ;;  %v3827_v61 = vld [vmem:[%s5210_s5 + $0x38] sm:$0xff]  }
 0x1be   :  { %v558_v1 = vpop.f32.mrf.mxu1 }
 0x1bf   :  { %v602_v4 = vmax.f32 %v557_v62, 0.0  ;;  %v604_v57 = vpack.c.bf16 %v601_v63, %v601_v63  ;;  %v3825_v63 = vld [vmem:[%s5210_s5 + $0x8] sm:$0xff]   ;;  %v500_v1 = vadd.f32 %v499_v46, %v460_v55  ;;  %v3828_v46 = vld [vmem:[%s5210_s5 + $0x30] sm:$0xff]  }
 0x1c0   :  { %v595_v3 = vpop.f32.mrf.mxu0  ;;  %v559_v6 = vpop.f32.mrf.mxu1 }
 0x1c1   :  { %v596_v5 = vadd.f32 %v595_v3, %v4238_v50  ;;  %v605_v44 = vpack.c.bf16 %v602_v4, %v602_v4  ;;  %v3826_v3 = vld [vmem:[%s5210_s5] sm:$0xff]   ;;  %v505_v4 = vmax.f32 %v500_v1, 0.0  ;;  %v3829_v6 = vld [vmem:[%s5210_s5 + $0x28] sm:$0xff]  }
 0x1c2   :  { %v3493_v25 = vpop.f32.mrf.mxu0 }
 0x1c3   :  { %v603_v47 = vmax.f32 %v596_v5, 0.0  ;;  %642 = vmatprep.mubr.bf16.mxu1 %v605_v44  ;;  %v506_v5 = vpack.c.bf16 %v505_v4, %v505_v4  ;;  %v3830_v25 = vld [vmem:[%s5210_s5 + $0x20] sm:$0xff]   ;;  %v3003_v44 = vld [vmem:[%s5208_s0 + $0x8] sm:$0xf] }
 0x1c4   :  { %v598_v58 = vpop.f32.mrf.mxu0  ;;  %643 = vmatmul.mubr.bf16.vlgmr.msra.gmra.mxu1 %v604_v57 }
 0x1c5   :  { %v606_v60 = vpack.c.bf16 %v603_v47, %v603_v47  ;;  %3516 = vmatpush3.bf16.msra.mxu1 %v3823_v54  ;;  %3523 = vmatprep.mubr.msk.bf16.mxu1 %vm3935_vm1, %v3933_v0 }
 0x1c6   :  { %v3494_v62 = vpop.f32.mrf.mxu0  ;;  %3517 = vmatprep.subr.bf16.mxu1 %v3933_v0 }
 0x1c7   :  { %3500 = vmatmul.mubr.msk.bf16.vlgmr.msra.gmra.mxu0 %vm421_vm3, %v606_v60 }
 0x1c8   :  { %3504 = vmatpush3.bf16.msra.mxu0 %v3827_v61  ;;  %3511 = vmatprep.mubr.msk.bf16.mxu0 %vm3935_vm1, %v3933_v0 }
 0x1c9   :  { %3505 = vmatprep.subr.bf16.mxu0 %v3933_v0  ;;  %3518 = vmatpush3.bf16.msra.mxu1 %v3824_v52 }
 0x1ca   :  { %3519 = vmatprep.subr.bf16.mxu1 %v3933_v0 }
 0x1cc   :  { %3506 = vmatpush3.bf16.msra.mxu0 %v3828_v46 }
 0x1cd   :  { %3520 = vmatpush3.bf16.msra.mxu1 %v3825_v63  ;;  %3507 = vmatprep.subr.bf16.mxu0 %v3933_v0 }
 0x1ce   :  { %3521 = vmatprep.subr.bf16.mxu1 %v3933_v0 }
 0x1d0   :  { %3508 = vmatpush3.bf16.msra.mxu0 %v3829_v6 }
 0x1d1   :  { %3522 = vmatpush3.bf16.msra.mxu1 %v3826_v3  ;;  %3509 = vmatprep.subr.bf16.mxu0 %v3933_v0 }
 0x1d2   :  { %3527 = vmatprep.subr.bf16.mxu1 %v3933_v0 }
 0x1d4   :  { %3524 = vmatmul.mubr.msk.bf16.vlgmr.msra.gmra.mxu1 %vm724_vm4, %v506_v5  ;;  %3510 = vmatpush3.bf16.msra.mxu0 %v3830_v25 }
 0x1d5   :  { %3528 = vmatpush3.bf16.msra.mxu1 %v4009_v8  ;;  %3539 = vmatprep.mubr.msk.bf16.mxu1 %vm3935_vm1, %v3933_v0 }
 0x1d6   :  { %3529 = vmatprep.subr.bf16.mxu1 %v3933_v0  ;;  %844 = vmatprep.subr.bf16.mxu0 %v4007_v7 }
 0x1d9   :  { %3530 = vmatpush3.bf16.msra.mxu1 %v4023_v11 }
 0x1da   :  { %3531 = vmatprep.subr.bf16.mxu1 %v3933_v0 }
 0x1dd   :  { %3532 = vmatpush3.bf16.msra.mxu1 %v4042_v14 }
 0x1de   :  { %3533 = vmatprep.subr.bf16.mxu1 %v3933_v0 }
 0x1e1   :  { %3534 = vmatpush3.bf16.msra.mxu1 %v4061_v17 }
 0x1e2   :  { %3535 = vmatprep.subr.bf16.mxu1 %v3933_v0 }
 0x1e5   :  { %3536 = vmatpush3.bf16.msra.mxu1 %v4080_v20 }
 0x1e6   :  { %3537 = vmatprep.subr.bf16.mxu1 %v3933_v0 }
 0x1e9   :  { %3538 = vmatpush3.bf16.msra.mxu1 %v4099_v23 }
 0x1ea   :  { %3543 = vmatprep.subr.bf16.mxu1 %v3933_v0 }
 0x1ec   :  { %3540 = vmatmul.mubr.msk.bf16.vlgmr.msra.gmra.mxu1 %vm210_vm2, %v3003_v44 }
 0x1ed   :  { %3544 = vmatpush3.bf16.msra.mxu1 %v4126_v28  ;;  %3547 = vmatprep.mubr.msk.bf16.mxu1 %vm3935_vm1, %v3933_v0 }
 0x1ee   :  { %3545 = vmatprep.subr.bf16.mxu1 %v3933_v0 }
 0x1f1   :  { %3546 = vmatpush3.bf16.msra.mxu1 %v4206_v40 }
 0x1f2   :  { %3551 = vmatprep.subr.bf16.mxu1 %v3933_v0 }
 0x284   :  { %v3155_v47 = vpop.f32.mrf.mxu1 }
 0x286   :  { %v3156_v56 = vpop.f32.mrf.mxu1 }
 0x287   :  { %v684_v54 = vpop.f32.mrf.mxu0  ;;  %v3157_v57 = vadd.f32 %v3156_v56, %v3155_v47 }
 0x288   :  { %v3158_v60 = vpop.f32.mrf.mxu1 }
 0x289   :  { %v3501_v58 = vpop.f32.mrf.mxu0  ;;  %v645_v61 = vadd.f32 %v3157_v57, %v4315_v59  ;;  %v3831_v60 = vld [vmem:[%s5210_s5 + $0x58] sm:$0xff]  }
 0x28a   :  { %v3159_v52 = vpop.f32.mrf.mxu1 }
 0x28b   :  { %v687_v62 = vpop.f32.mrf.mxu0  ;;  %v685_v55 = vadd.f32 %v684_v54, %v645_v61 }
 0x28d   :  { %v3502_v63 = vpop.f32.mrf.mxu0  ;;  %v690_v1 = vmax.f32 %v685_v55, 0.0 }
 0x28f   :  { %v691_v3 = vpack.c.bf16 %v690_v1, %v690_v1 }
 0x291   :  { %3512 = vmatmul.mubr.msk.bf16.vlgmr.msra.gmra.mxu0 %vm724_vm4, %v691_v3 }
 0x292   :  { %845 = vmatpush1.bf16.msra.mxu0 %v4011_v9  ;;  %872 = vmatprep.mubr.bf16.mxu0 %v3934_v2 }
 0x293   :  { %846 = vmatprep.subr.bf16.mxu0 %v4016_v10 }
 0x294   :  { %v4382_v4 = vpop.f32.mrf.mxu1 }
 0x296   :  { %v3525_v5 = vpop.f32.mrf.mxu1  ;;  %847 = vmatpush1.bf16.msra.mxu0 %v4030_v12 }
 0x297   :  { %848 = vmatprep.subr.bf16.mxu0 %v4036_v13 }
 0x298   :  { %v832_v46 = vpop.f32.mrf.mxu1 }
 0x29a   :  { %v3526_v6 = vpop.f32.mrf.mxu1  ;;  %849 = vmatpush1.bf16.msra.mxu0 %v4049_v15 }
 0x29b   :  { %850 = vmatprep.subr.bf16.mxu0 %v4055_v16 }
 0x29e   :  { %851 = vmatpush1.bf16.msra.mxu0 %v4068_v18 }
 0x29f   :  { %852 = vmatprep.subr.bf16.mxu0 %v4074_v19 }
 0x2a2   :  { %853 = vmatpush1.bf16.msra.mxu0 %v4087_v21 }
 0x2a3   :  { %854 = vmatprep.subr.bf16.mxu0 %v4093_v22 }
 0x2a6   :  { %855 = vmatpush1.bf16.msra.mxu0 %v4106_v24 }
 0x2a7   :  { %3181 = vmatprep.subr.bf16.mxu0 %v4115_v26 }
 0x2a9   :  { %3004 = vmatmul.mubr.msk.bf16.vlgmr.msra.gmra.mxu0 %vm210_vm2, %v3003_v44 }
 0x2aa   :  { %3182 = vmatpush3.bf16.msra.mxu0 %v4120_v27 }
 0x2ab   :  { %3183 = vmatprep.subr.bf16.mxu0 %v4132_v29 }
 0x2ac   :  { %v915_v25 = vpop.f32.mrf.mxu1 }
 0x2ad   :  { %v916_v44 = vadd.f32 %v915_v25, %v4238_v50 }
 0x2ae   :  { %3184 = vmatpush3.bf16.msra.mxu0 %v4143_v30  ;;  %v3541_v47 = vpop.f32.mrf.mxu1 }
 0x2af   :  { %3185 = vmatprep.subr.bf16.mxu0 %v4150_v31  ;;  %v923_v54 = vmax.f32 %v916_v44, 0.0 }
 0x2b0   :  { %v918_v56 = vpop.f32.mrf.mxu1 }
 0x2b1   :  { %v926_v57 = vpack.c.bf16 %v923_v54, %v923_v54 }
 0x2b2   :  { %3186 = vmatpush3.bf16.msra.mxu0 %v4158_v32  ;;  %v3542_v58 = vpop.f32.mrf.mxu1 }
 0x2b3   :  { %3187 = vmatprep.subr.bf16.mxu0 %v4164_v33  ;;  %3548 = vmatmul.mubr.msk.bf16.vlgmr.msra.gmra.mxu1 %vm421_vm3, %v926_v57  ;;  %v3834_v58 = vld [vmem:[%s5210_s5 + $0x40] sm:$0xff]  }
 0x2b4   :  { %3559 = vmatprep.mubr.msk.bf16.mxu1 %vm3935_vm1, %v3933_v0  ;;  %3552 = vmatpush3.bf16.msra.mxu1 %v3831_v60  ;;  %v3012_v60 = vld [vmem:[%s5208_s0 + $0xc] sm:$0xf] }
 0x2b5   :  { %3553 = vmatprep.subr.bf16.mxu1 %v3933_v0 }
 0x2b6   :  { %3188 = vmatpush3.bf16.msra.mxu0 %v4170_v34 }
 0x2b7   :  { %3189 = vmatprep.subr.bf16.mxu0 %v4176_v35 }
 0x2ba   :  { %3190 = vmatpush3.bf16.msra.mxu0 %v4182_v36 }
 0x2bb   :  { %3191 = vmatprep.subr.bf16.mxu0 %v4188_v37 }
 0x2be   :  { %3192 = vmatpush3.bf16.msra.mxu0 %v4194_v38 }
 0x2bf   :  { %3193 = vmatprep.subr.bf16.mxu0 %v4201_v39 }
 0x2c2   :  { %3194 = vmatpush3.bf16.msra.mxu0 %v4211_v41 }
 0x2c3   :  { %3195 = vmatprep.subr.bf16.mxu0 %v4220_v42 }
 0x2c6   :  { %3196 = vmatpush3.bf16.msra.mxu0 %v4225_v43 }
 0x2c7   :  { %3563 = vmatprep.subr.bf16.mxu0 %v3933_v0 }
 0x351   :  { %v4419_v61 = vpop.f32.mrf.mxu0 }
 0x353   :  { %v3513_v62 = vpop.f32.mrf.mxu0 }
 0x355   :  { %v765_v52 = vpop.f32.mrf.mxu0 }
 0x357   :  { %v3514_v55 = vpop.f32.mrf.mxu0 }
 0x369   :  { %v874_v63 = vpop.f32.mrf.mxu0 }
 0x36a   :  { %v875_v1 = vadd.f32 %v874_v63, %v4242_v51 }
 0x36b   :  { %v876_v3 = vpop.f32.mrf.mxu0 }
 0x36c   :  { %v877_v5 = vadd.f32 %v876_v3, %v4246_v53  ;;  %v921_v46 = vmax.f32 %v875_v1, 0.0 }
 0x36d   :  { %v878_v6 = vpop.f32.mrf.mxu0 }
 0x36e   :  { %v922_v25 = vmax.f32 %v877_v5, 0.0  ;;  %v924_v54 = vpack.c.bf16 %v921_v46, %v921_v46 }
 0x36f   :  { %v879_v44 = vpop.f32.mrf.mxu0 }
 0x370   :  { %v925_v47 = vpack.c.bf16 %v922_v25, %v922_v25 }
 0x372   :  { %962 = vmatprep.mubr.bf16.mxu0 %v925_v47 }
 0x373   :  { %963 = vmatmul.mubr.bf16.vlgmr.msra.gmra.mxu0 %v924_v54  ;;  %v1004_v56 = vpop.f32.mrf.mxu1 }
 0x374   :  { %3564 = vmatpush3.bf16.msra.mxu0 %v4009_v8  ;;  %3575 = vmatprep.mubr.msk.bf16.mxu0 %vm3935_vm1, %v3933_v0 }
 0x375   :  { %3565 = vmatprep.subr.bf16.mxu0 %v3933_v0 }
 0x378   :  { %3566 = vmatpush3.bf16.msra.mxu0 %v4023_v11  ;;  %v3832_v11 = vld [vmem:[%s5210_s5 + $0x50] sm:$0xff]  }
 0x379   :  { %3567 = vmatprep.subr.bf16.mxu0 %v3933_v0  ;;  %3554 = vmatpush3.bf16.msra.mxu1 %v3832_v11 }
 0x37a   :  { %3555 = vmatprep.subr.bf16.mxu1 %v3933_v0 }
 0x37c   :  { %3568 = vmatpush3.bf16.msra.mxu0 %v4042_v14  ;;  %v3549_v14 = vpop.f32.mrf.mxu1 }
 0x37d   :  { %3569 = vmatprep.subr.bf16.mxu0 %v3933_v0 }
 0x380   :  { %3570 = vmatpush3.bf16.msra.mxu0 %v4061_v17  ;;  %v3833_v17 = vld [vmem:[%s5210_s5 + $0x48] sm:$0xff]  }
 0x381   :  { %3571 = vmatprep.subr.bf16.mxu0 %v3933_v0  ;;  %3556 = vmatpush3.bf16.msra.mxu1 %v3833_v17 }
 0x382   :  { %3557 = vmatprep.subr.bf16.mxu1 %v3933_v0 }
 0x384   :  { %3572 = vmatpush3.bf16.msra.mxu0 %v4080_v20  ;;  %v1007_v20 = vpop.f32.mrf.mxu1 }
 0x385   :  { %3573 = vmatprep.subr.bf16.mxu0 %v3933_v0  ;;  %3558 = vmatpush3.bf16.msra.mxu1 %v3834_v58 }
 0x386   :  { %v3550_v57 = vpop.f32.mrf.mxu1  ;;  %1097 = vmatprep.subr.bf16.mxu1 %v4007_v7 }
 0x388   :  { %3574 = vmatpush3.bf16.msra.mxu0 %v4099_v23 }
 0x389   :  { %3579 = vmatprep.subr.bf16.mxu0 %v3933_v0 }
 0x38b   :  { %3576 = vmatmul.mubr.msk.bf16.vlgmr.msra.gmra.mxu0 %vm210_vm2, %v3012_v60 }
 0x38c   :  { %3580 = vmatpush3.bf16.msra.mxu0 %v4126_v28  ;;  %3583 = vmatprep.mubr.msk.bf16.mxu0 %vm3935_vm1, %v3933_v0 }
 0x38d   :  { %3581 = vmatprep.subr.bf16.mxu0 %v3933_v0 }
 0x390   :  { %3582 = vmatpush3.bf16.msra.mxu0 %v4206_v40 }
 0x391   :  { %3587 = vmatprep.subr.bf16.mxu0 %v3933_v0 }
 0x433   :  { %v3197_v62 = vpop.f32.mrf.mxu0 }
 0x435   :  { %v3198_v52 = vpop.f32.mrf.mxu0 }
 0x436   :  { %v3199_v55 = vadd.f32 %v3198_v52, %v3197_v62  ;;  %v4533_v62 = vld [vmem:[%s5206_s1 + $0x20] ss:$12 sps:$4 sm:$0xff]   ;;  %v3836_v52 = vld [vmem:[%s5210_s5 + $0x70] sm:$0xff]  }
 0x437   :  { %v3200_v63 = vpop.f32.mrf.mxu0 }
 0x438   :  { %v965_v1 = vadd.f32 %v3199_v55, %v4315_v59 }
 0x439   :  { %v3201_v3 = vpop.f32.mrf.mxu0 }
 0x43a   :  { %v1005_v5 = vadd.f32 %v1004_v56, %v965_v1  ;;  %v3837_v1 = vld [vmem:[%s5210_s5 + $0x68] sm:$0xff]  }
 0x43c   :  { %v1010_v46 = vmax.f32 %v1005_v5, 0.0 }
 0x43e   :  { %v1011_v6 = vpack.c.bf16 %v1010_v46, %v1010_v46  ;;  %v3021_v46 = vld [vmem:[%s5208_s0 + $0x10] sm:$0xf] }
 0x440   :  { %3560 = vmatmul.mubr.msk.bf16.vlgmr.msra.gmra.mxu1 %vm724_vm4, %v1011_v6 }
 0x441   :  { %1098 = vmatpush1.bf16.msra.mxu1 %v4011_v9  ;;  %1125 = vmatprep.mubr.bf16.mxu1 %v3934_v2 }
 0x442   :  { %1099 = vmatprep.subr.bf16.mxu1 %v4016_v10 }
 0x445   :  { %1100 = vmatpush1.bf16.msra.mxu1 %v4030_v12 }
 0x446   :  { %1101 = vmatprep.subr.bf16.mxu1 %v4036_v13 }
 0x449   :  { %1102 = vmatpush1.bf16.msra.mxu1 %v4049_v15 }
 0x44a   :  { %1103 = vmatprep.subr.bf16.mxu1 %v4055_v16 }
 0x44b   :  { %v1168_v10 = vpop.f32.mrf.mxu0 }
 0x44c   :  { %v1169_v12 = vadd.f32 %v1168_v10, %v4238_v50 }
 0x44d   :  { %1104 = vmatpush1.bf16.msra.mxu1 %v4068_v18  ;;  %v3577_v13 = vpop.f32.mrf.mxu0 }
 0x44e   :  { %1105 = vmatprep.subr.bf16.mxu1 %v4074_v19  ;;  %v1176_v15 = vmax.f32 %v1169_v12, 0.0 }
 0x44f   :  { %v1171_v16 = vpop.f32.mrf.mxu0 }
 0x450   :  { %v1179_v18 = vpack.c.bf16 %v1176_v15, %v1176_v15 }
 0x451   :  { %1106 = vmatpush1.bf16.msra.mxu1 %v4087_v21  ;;  %v3578_v19 = vpop.f32.mrf.mxu0  ;;  %v3835_v21 = vld [vmem:[%s5210_s5 + $0x78] sm:$0xff]  }
 0x452   :  { %1107 = vmatprep.subr.bf16.mxu1 %v4093_v22  ;;  %3584 = vmatmul.mubr.msk.bf16.vlgmr.msra.gmra.mxu0 %vm421_vm3, %v1179_v18  ;;  %v830_v22 = vadd.f32 %v4382_v4, %v4419_v61  ;;  %v4512_v4 = vld [vmem:[%s5206_s1 + $0x68] ss:$12 sps:$4 sm:$0xff]   ;;  %v4519_v61 = vld [vmem:[%s5206_s1 + $0x50] ss:$12 sps:$4 sm:$0xff]  }
 0x453   :  { %3595 = vmatprep.mubr.msk.bf16.mxu0 %vm3935_vm1, %v3933_v0  ;;  %3588 = vmatpush3.bf16.msra.mxu0 %v3835_v21 }
 0x454   :  { %3589 = vmatprep.subr.bf16.mxu0 %v3933_v0 }
 0x455   :  { %1108 = vmatpush1.bf16.msra.mxu1 %v4106_v24 }
 0x456   :  { %3218 = vmatprep.subr.bf16.mxu1 %v4115_v26 }
 0x457   :  { %3590 = vmatpush3.bf16.msra.mxu0 %v3836_v52 }
 0x458   :  { %3013 = vmatmul.mubr.msk.bf16.vlgmr.msra.gmra.mxu1 %vm210_vm2, %v3012_v60  ;;  %v4526_v60 = vld [vmem:[%s5206_s1 + $0x38] ss:$12 sps:$4 sm:$0xff]   ;;  %3591 = vmatprep.subr.bf16.mxu0 %v3933_v0 }
 0x459   :  { %3219 = vmatpush3.bf16.msra.mxu1 %v4120_v27 }
 0x45a   :  { %3220 = vmatprep.subr.bf16.mxu1 %v4132_v29 }
 0x45b   :  { %3592 = vmatpush3.bf16.msra.mxu0 %v3837_v1 }
 0x45c   :  { %3593 = vmatprep.subr.bf16.mxu0 %v3933_v0 }
 0x45d   :  { %3221 = vmatpush3.bf16.msra.mxu1 %v4143_v30 }
 0x45e   :  { %3222 = vmatprep.subr.bf16.mxu1 %v4150_v31 }
 0x461   :  { %3223 = vmatpush3.bf16.msra.mxu1 %v4158_v32 }
 0x462   :  { %3224 = vmatprep.subr.bf16.mxu1 %v4164_v33 }
 0x465   :  { %3225 = vmatpush3.bf16.msra.mxu1 %v4170_v34 }
 0x466   :  { %3226 = vmatprep.subr.bf16.mxu1 %v4176_v35 }
 0x469   :  { %3227 = vmatpush3.bf16.msra.mxu1 %v4182_v36 }
 0x46a   :  { %3228 = vmatprep.subr.bf16.mxu1 %v4188_v37 }
 0x46d   :  { %3229 = vmatpush3.bf16.msra.mxu1 %v4194_v38 }
 0x46e   :  { %3230 = vmatprep.subr.bf16.mxu1 %v4201_v39 }
 0x471   :  { %3231 = vmatpush3.bf16.msra.mxu1 %v4211_v41 }
 0x472   :  { %3232 = vmatprep.subr.bf16.mxu1 %v4220_v42 }
 0x475   :  { %3233 = vmatpush3.bf16.msra.mxu1 %v4225_v43 }
 0x476   :  { %3599 = vmatprep.subr.bf16.mxu1 %v3933_v0 }
 0x500   :  { %v1081_v24 = vpop.f32.mrf.mxu1 }
 0x501   :  { %v4501_v26 = vadd.f32 %v1081_v24, %v830_v22  ;;  %v4580_v22 = vld [vmem:[%s5206_s1 + $0x4c] ss:$12 sps:$4 sm:$0xff]   ;;  %v4586_v24 = vld [vmem:[%s5206_s1 + $0x48] ss:$12 sps:$4 sm:$0xff]  }
 0x502   :  { %v3561_v27 = vpop.f32.mrf.mxu1 }
 0x503   :  { %v4592_v27 = vld [vmem:[%s5206_s1 + $0x34] ss:$12 sps:$4 sm:$0xff]  }
 0x504   :  { %v1084_v29 = vpop.f32.mrf.mxu1 }
 0x505   :  { %v4598_v29 = vld [vmem:[%s5206_s1 + $0x30] ss:$12 sps:$4 sm:$0xff]  }
 0x506   :  { %v3562_v25 = vpop.f32.mrf.mxu1 }
 0x507   :  { %v4604_v25 = vld [vmem:[%s5206_s1 + $0x1c] ss:$12 sps:$4 sm:$0xff]  }
 0x512   :  { %v1257_v55 = vpop.f32.mrf.mxu0 }
 0x514   :  { %v3585_v63 = vpop.f32.mrf.mxu0 }
 0x516   :  { %v1260_v3 = vpop.f32.mrf.mxu0 }
 0x518   :  { %v1127_v44 = vpop.f32.mrf.mxu1  ;;  %v3586_v5 = vpop.f32.mrf.mxu0 }
 0x519   :  { %v1128_v47 = vadd.f32 %v1127_v44, %v4242_v51  ;;  %v4610_v44 = vld [vmem:[%s5206_s1 + $0x18] ss:$12 sps:$4 sm:$0xff]  }
 0x51a   :  { %v1129_v54 = vpop.f32.mrf.mxu1 }
 0x51b   :  { %v1130_v11 = vadd.f32 %v1129_v54, %v4246_v53  ;;  %v1174_v56 = vmax.f32 %v1128_v47, 0.0  ;;  %v4616_v47 = vld [vmem:[%s5206_s1 + $0x4] ss:$12 sps:$4 sm:$0xff]   ;;  %v4622_v54 = vld [vmem:[%s5206_s1] ss:$12 sps:$4 sm:$0xff]  }
 0x51c   :  { %v1131_v14 = vpop.f32.mrf.mxu1 }
 0x51d   :  { %v1175_v17 = vmax.f32 %v1130_v11, 0.0  ;;  %v1177_v58 = vpack.c.bf16 %v1174_v56, %v1174_v56  ;;  %v4628_v11 = vld [vmem:[%s5207_s3 + $0x78] sm:$0xff]   ;;  %v4641_v14 = vld [vmem:[%s5207_s3 + $0x70] sm:$0xff]  }
 0x51e   :  { %v1132_v20 = vpop.f32.mrf.mxu1  ;;  %v4635_v56 = vld [vmem:[%s5207_s3 + $0x38] sm:$0xff]  }
 0x51f   :  { %v1178_v57 = vpack.c.bf16 %v1175_v17, %v1175_v17 }
 0x521   :  { %1215 = vmatprep.mubr.bf16.mxu1 %v1178_v57 }
 0x522   :  { %1216 = vmatmul.mubr.bf16.vlgmr.msra.gmra.mxu1 %v1177_v58 }
 0x523   :  { %3600 = vmatpush3.bf16.msra.mxu1 %v4009_v8  ;;  %3611 = vmatprep.mubr.msk.bf16.mxu1 %vm3935_vm1, %v3933_v0 }
 0x524   :  { %3601 = vmatprep.subr.bf16.mxu1 %v3933_v0 }
 0x527   :  { %3602 = vmatpush3.bf16.msra.mxu1 %v4512_v4 }
 0x528   :  { %3603 = vmatprep.subr.bf16.mxu1 %v3933_v0 }
 0x52b   :  { %3604 = vmatpush3.bf16.msra.mxu1 %v4519_v61 }
 0x52c   :  { %3605 = vmatprep.subr.bf16.mxu1 %v3933_v0 }
 0x52f   :  { %3606 = vmatpush3.bf16.msra.mxu1 %v4526_v60 }
 0x530   :  { %3607 = vmatprep.subr.bf16.mxu1 %v3933_v0 }
 0x533   :  { %3608 = vmatpush3.bf16.msra.mxu1 %v4533_v62 }
 0x534   :  { %3609 = vmatprep.subr.bf16.mxu1 %v3933_v0 }
 0x537   :  { %3610 = vmatpush3.bf16.msra.mxu1 %v4099_v23  ;;  %v3838_v23 = vld [vmem:[%s5210_s5 + $0x60] sm:$0xff]  }
 0x538   :  { %3615 = vmatprep.subr.bf16.mxu1 %v3933_v0  ;;  %3594 = vmatpush3.bf16.msra.mxu0 %v3838_v23  ;;  %v3840_v23 = vld [vmem:[%s5210_s5 + $0x90] sm:$0xff]  }
 0x539   :  { %1350 = vmatprep.subr.bf16.mxu0 %v4007_v7 }
 0x53a   :  { %3612 = vmatmul.mubr.msk.bf16.vlgmr.msra.gmra.mxu1 %vm210_vm2, %v3021_v46 }
 0x53b   :  { %3616 = vmatpush3.bf16.msra.mxu1 %v4126_v28  ;;  %3619 = vmatprep.mubr.msk.bf16.mxu1 %vm3935_vm1, %v3933_v0  ;;  %v4568_v28 = vld [vmem:[%s5206_s1 + $0x64] ss:$12 sps:$4 sm:$0xff]  }
 0x53c   :  { %3617 = vmatprep.subr.bf16.mxu1 %v3933_v0 }
 0x53f   :  { %3618 = vmatpush3.bf16.msra.mxu1 %v4206_v40  ;;  %v4574_v40 = vld [vmem:[%s5206_s1 + $0x60] ss:$12 sps:$4 sm:$0xff]  }
 0x540   :  { %3623 = vmatprep.subr.bf16.mxu1 %v3933_v0 }
 0x5e2   :  { %v3234_v6 = vpop.f32.mrf.mxu1 }
 0x5e4   :  { %v3235_v10 = vpop.f32.mrf.mxu1 }
 0x5e5   :  { %v3236_v12 = vadd.f32 %v3235_v10, %v3234_v6  ;;  %v3841_v10 = vld [vmem:[%s5210_s5 + $0x88] sm:$0xff]  }
 0x5e6   :  { %v3237_v13 = vpop.f32.mrf.mxu1 }
 0x5e7   :  { %v1218_v15 = vadd.f32 %v3236_v12, %v4315_v59 }
 0x5e8   :  { %v3238_v16 = vpop.f32.mrf.mxu1 }
 0x5e9   :  { %v1258_v18 = vadd.f32 %v1257_v55, %v1218_v15  ;;  %v3842_v15 = vld [vmem:[%s5210_s5 + $0x80] sm:$0xff]   ;;  %v3030_v16 = vld [vmem:[%s5208_s0 + $0x14] sm:$0xf] }
 0x5eb   :  { %v1263_v19 = vmax.f32 %v1258_v18, 0.0  ;;  %v4709_v18 = vld [vmem:[%s5207_s3 + $0x88] sm:$0xff]  }
 0x5ed   :  { %v1264_v21 = vpack.c.bf16 %v1263_v19, %v1263_v19  ;;  %v4718_v19 = vld [vmem:[%s5207_s3 + $0x80] sm:$0xff]  }
 0x5ef   :  { %3596 = vmatmul.mubr.msk.bf16.vlgmr.msra.gmra.mxu0 %vm724_vm4, %v1264_v21 }
 0x5f0   :  { %1351 = vmatpush1.bf16.msra.mxu0 %v4011_v9  ;;  %1378 = vmatprep.mubr.bf16.mxu0 %v3934_v2 }
 0x5f1   :  { %1352 = vmatprep.subr.bf16.mxu0 %v4568_v28 }
 0x5f4   :  { %1353 = vmatpush1.bf16.msra.mxu0 %v4574_v40 }
 0x5f5   :  { %1354 = vmatprep.subr.bf16.mxu0 %v4580_v22 }
 0x5f8   :  { %1355 = vmatpush1.bf16.msra.mxu0 %v4586_v24 }
 0x5f9   :  { %1356 = vmatprep.subr.bf16.mxu0 %v4592_v27 }
 0x5fc   :  { %1357 = vmatpush1.bf16.msra.mxu0 %v4598_v29 }
 0x5fd   :  { %1358 = vmatprep.subr.bf16.mxu0 %v4604_v25 }
 0x600   :  { %1359 = vmatpush1.bf16.msra.mxu0 %v4610_v44 }
 0x601   :  { %1360 = vmatprep.subr.bf16.mxu0 %v4616_v47 }
 0x604   :  { %1361 = vmatpush1.bf16.msra.mxu0 %v4622_v54 }
 0x605   :  { %3255 = vmatprep.subr.bf16.mxu0 %v4628_v11 }
 0x607   :  { %3022 = vmatmul.mubr.msk.bf16.vlgmr.msra.gmra.mxu0 %vm210_vm2, %v3021_v46 }
 0x608   :  { %3256 = vmatpush3.bf16.msra.mxu0 %v4635_v56 }
 0x609   :  { %3257 = vmatprep.subr.bf16.mxu0 %v4641_v14 }
 0x60c   :  { %3258 = vmatpush3.bf16.msra.mxu0 %v4143_v30  ;;  %v1421_v30 = vpop.f32.mrf.mxu1 }
 0x60d   :  { %3259 = vmatprep.subr.bf16.mxu0 %v4150_v31  ;;  %v1422_v31 = vadd.f32 %v1421_v30, %v4238_v50 }
 0x610   :  { %3260 = vmatpush3.bf16.msra.mxu0 %v4158_v32  ;;  %v3613_v32 = vpop.f32.mrf.mxu1 }
 0x611   :  { %3261 = vmatprep.subr.bf16.mxu0 %v4164_v33  ;;  %v1429_v33 = vmax.f32 %v1422_v31, 0.0 }
 0x614   :  { %3262 = vmatpush3.bf16.msra.mxu0 %v4170_v34  ;;  %v1424_v34 = vpop.f32.mrf.mxu1 }
 0x615   :  { %3263 = vmatprep.subr.bf16.mxu0 %v4176_v35  ;;  %v1432_v35 = vpack.c.bf16 %v1429_v33, %v1429_v33 }
 0x617   :  { %3620 = vmatmul.mubr.msk.bf16.vlgmr.msra.gmra.mxu1 %vm421_vm3, %v1432_v35 }
 0x618   :  { %3264 = vmatpush3.bf16.msra.mxu0 %v4182_v36  ;;  %v3614_v36 = vpop.f32.mrf.mxu1  ;;  %3631 = vmatprep.mubr.msk.bf16.mxu1 %vm3935_vm1, %v3933_v0 }
 0x619   :  { %3265 = vmatprep.subr.bf16.mxu0 %v4188_v37  ;;  %v3839_v37 = vld [vmem:[%s5210_s5 + $0x98] sm:$0xff]  }
 0x61a   :  { %3624 = vmatpush3.bf16.msra.mxu1 %v3839_v37 }
 0x61b   :  { %3625 = vmatprep.subr.bf16.mxu1 %v3933_v0 }
 0x61c   :  { %3266 = vmatpush3.bf16.msra.mxu0 %v4194_v38 }
 0x61d   :  { %3267 = vmatprep.subr.bf16.mxu0 %v4201_v39 }
 0x61e   :  { %3626 = vmatpush3.bf16.msra.mxu1 %v3840_v23 }
 0x61f   :  { %3627 = vmatprep.subr.bf16.mxu1 %v3933_v0 }
 0x620   :  { %3268 = vmatpush3.bf16.msra.mxu0 %v4211_v41 }
 0x621   :  { %3269 = vmatprep.subr.bf16.mxu0 %v4220_v42 }
 0x622   :  { %3628 = vmatpush3.bf16.msra.mxu1 %v3841_v10 }
 0x623   :  { %3629 = vmatprep.subr.bf16.mxu1 %v3933_v0 }
 0x624   :  { %3270 = vmatpush3.bf16.msra.mxu0 %v4225_v43 }
 0x625   :  { %3635 = vmatprep.subr.bf16.mxu0 %v3933_v0 }
 0x626   :  { %3630 = vmatpush3.bf16.msra.mxu1 %v3842_v15  ;;  %v3843_v15 = vld [vmem:[%s5210_s5 + $0xb8] sm:$0xff]  }
 0x627   :  { %1603 = vmatprep.subr.bf16.mxu1 %v4007_v7 }
 0x6af   :  { %v1334_v38 = vpop.f32.mrf.mxu0 }
 0x6b0   :  { %v4667_v39 = vadd.f32 %v1334_v38, %v4501_v26  ;;  %v4686_v26 = vld [vmem:[%s5206_s1 + $0x8] ss:$12 sps:$4 sm:$0xff]  }
 0x6b1   :  { %v3597_v41 = vpop.f32.mrf.mxu0  ;;  %v4743_v38 = vld [vmem:[%s5207_s3 + $0x30] sm:$0xff]  }
 0x6b2   :  { %v4749_v41 = vld [vmem:[%s5207_s3 + $0x68] sm:$0xff]  }
 0x6b3   :  { %v1337_v42 = vpop.f32.mrf.mxu0 }
 0x6b4   :  { %v4755_v42 = vld [vmem:[%s5207_s3 + $0x28] sm:$0xff]  }
 0x6b5   :  { %v3598_v43 = vpop.f32.mrf.mxu0 }
 0x6b6   :  { %v4761_v43 = vld [vmem:[%s5207_s3 + $0x60] sm:$0xff]  }
 0x6c7   :  { %v1380_v17 = vpop.f32.mrf.mxu0 }
 0x6c8   :  { %v1381_v20 = vadd.f32 %v1380_v17, %v4242_v51  ;;  %v4767_v17 = vld [vmem:[%s5207_s3 + $0x20] sm:$0xff]  }
 0x6c9   :  { %v1382_v57 = vpop.f32.mrf.mxu0 }
 0x6ca   :  { %v1383_v58 = vadd.f32 %v1382_v57, %v4246_v53  ;;  %v1427_v52 = vmax.f32 %v1381_v20, 0.0  ;;  %v4773_v20 = vld [vmem:[%s5207_s3 + $0x58] sm:$0xff]  }
 0x6cb   :  { %v1384_v55 = vpop.f32.mrf.mxu0  ;;  %v4779_v57 = vld [vmem:[%s5207_s3 + $0x18] sm:$0xff]  }
 0x6cc   :  { %v1428_v63 = vmax.f32 %v1383_v58, 0.0  ;;  %v1430_v5 = vpack.c.bf16 %v1427_v52, %v1427_v52  ;;  %v4785_v58 = vld [vmem:[%s5207_s3 + $0x50] sm:$0xff]   ;;  %v4797_v55 = vld [vmem:[%s5207_s3 + $0x48] sm:$0xff]  }
 0x6cd   :  { %v1385_v1 = vpop.f32.mrf.mxu0  ;;  %v4791_v52 = vld [vmem:[%s5207_s3 + $0x10] sm:$0xff]  }
 0x6ce   :  { %v1431_v3 = vpack.c.bf16 %v1428_v63, %v1428_v63  ;;  %v4803_v63 = vld [vmem:[%s5207_s3 + $0x8] sm:$0xff]   ;;  %v4809_v1 = vld [vmem:[%s5207_s3 + $0x40] sm:$0xff]  }
 0x6d0   :  { %1468 = vmatprep.mubr.bf16.mxu0 %v1431_v3  ;;  %v4815_v3 = vld [vmem:[%s5207_s3] sm:$0xff]  }
 0x6d1   :  { %1469 = vmatmul.mubr.bf16.vlgmr.msra.gmra.mxu0 %v1430_v5 }
 0x6d2   :  { %3636 = vmatpush3.bf16.msra.mxu0 %v4009_v8  ;;  %3647 = vmatprep.mubr.msk.bf16.mxu0 %vm3935_vm1, %v3933_v0 }
 0x6d3   :  { %3637 = vmatprep.subr.bf16.mxu0 %v3933_v0 }
 0x6d6   :  { %3638 = vmatpush3.bf16.msra.mxu0 %v4512_v4 }
 0x6d7   :  { %3639 = vmatprep.subr.bf16.mxu0 %v3933_v0  ;;  %v1510_v46 = vpop.f32.mrf.mxu1 }
 0x6d9   :  { %v3621_v6 = vpop.f32.mrf.mxu1 }
 0x6da   :  { %3640 = vmatpush3.bf16.msra.mxu0 %v4519_v61 }
 0x6db   :  { %3641 = vmatprep.subr.bf16.mxu0 %v3933_v0  ;;  %v1513_v12 = vpop.f32.mrf.mxu1 }
 0x6dd   :  { %v3622_v13 = vpop.f32.mrf.mxu1 }
 0x6de   :  { %3642 = vmatpush3.bf16.msra.mxu0 %v4526_v60 }
 0x6df   :  { %3643 = vmatprep.subr.bf16.mxu0 %v3933_v0 }
 0x6e2   :  { %3644 = vmatpush3.bf16.msra.mxu0 %v4533_v62 }
 0x6e3   :  { %3645 = vmatprep.subr.bf16.mxu0 %v3933_v0 }
 0x6e6   :  { %3646 = vmatpush3.bf16.msra.mxu0 %v4686_v26 }
 0x6e7   :  { %3651 = vmatprep.subr.bf16.mxu0 %v3933_v0 }
 0x6e9   :  { %3648 = vmatmul.mubr.msk.bf16.vlgmr.msra.gmra.mxu0 %vm210_vm2, %v3030_v16 }
 0x6ea   :  { %3652 = vmatpush3.bf16.msra.mxu0 %v4709_v18  ;;  %3655 = vmatprep.mubr.msk.bf16.mxu0 %vm3935_vm1, %v3933_v0 }
 0x6eb   :  { %3653 = vmatprep.subr.bf16.mxu0 %v3933_v0 }
 0x6ee   :  { %3654 = vmatpush3.bf16.msra.mxu0 %v4718_v19 }
 0x6ef   :  { %3659 = vmatprep.subr.bf16.mxu0 %v3933_v0 }
 0x791   :  { %v3271_v21 = vpop.f32.mrf.mxu0 }
 0x793   :  { %v3272_v30 = vpop.f32.mrf.mxu0 }
 0x794   :  { %v3273_v31 = vadd.f32 %v3272_v30, %v3271_v21 }
 0x795   :  { %v3274_v32 = vpop.f32.mrf.mxu0 }
 0x796   :  { %v1471_v33 = vadd.f32 %v3273_v31, %v4315_v59 }
 0x797   :  { %v3275_v34 = vpop.f32.mrf.mxu0 }
 0x798   :  { %v1511_v35 = vadd.f32 %v1510_v46, %v1471_v33 }
 0x79a   :  { %v1516_v36 = vmax.f32 %v1511_v35, 0.0 }
 0x79c   :  { %v1517_v37 = vpack.c.bf16 %v1516_v36, %v1516_v36 }
 0x79e   :  { %3632 = vmatmul.mubr.msk.bf16.vlgmr.msra.gmra.mxu1 %vm724_vm4, %v1517_v37 }
 0x79f   :  { %1604 = vmatpush1.bf16.msra.mxu1 %v4011_v9  ;;  %1631 = vmatprep.mubr.bf16.mxu1 %v3934_v2 }
 0x7a0   :  { %1605 = vmatprep.subr.bf16.mxu1 %v4568_v28 }
 0x7a3   :  { %1606 = vmatpush1.bf16.msra.mxu1 %v4574_v40 }
 0x7a4   :  { %1607 = vmatprep.subr.bf16.mxu1 %v4580_v22 }
 0x7a7   :  { %1608 = vmatpush1.bf16.msra.mxu1 %v4586_v24 }
 0x7a8   :  { %1609 = vmatprep.subr.bf16.mxu1 %v4592_v27 }
 0x7a9   :  { %v1674_v5 = vpop.f32.mrf.mxu0 }
 0x7aa   :  { %v1675_v23 = vadd.f32 %v1674_v5, %v4238_v50 }
 0x7ab   :  { %1610 = vmatpush1.bf16.msra.mxu1 %v4598_v29  ;;  %v3649_v46 = vpop.f32.mrf.mxu0 }
 0x7ac   :  { %1611 = vmatprep.subr.bf16.mxu1 %v4604_v25  ;;  %v1682_v6 = vmax.f32 %v1675_v23, 0.0 }
 0x7ad   :  { %v1677_v10 = vpop.f32.mrf.mxu0 }
 0x7ae   :  { %v1685_v12 = vpack.c.bf16 %v1682_v6, %v1682_v6 }
 0x7af   :  { %1612 = vmatpush1.bf16.msra.mxu1 %v4610_v44  ;;  %v3650_v13 = vpop.f32.mrf.mxu0 }
 0x7b0   :  { %1613 = vmatprep.subr.bf16.mxu1 %v4616_v47  ;;  %3656 = vmatmul.mubr.msk.bf16.vlgmr.msra.gmra.mxu0 %vm421_vm3, %v1685_v12 }
 0x7b1   :  { %3667 = vmatprep.mubr.msk.bf16.mxu0 %vm3935_vm1, %v3933_v0  ;;  %3660 = vmatpush3.bf16.msra.mxu0 %v3843_v15  ;;  %v3845_v15 = vld [vmem:[%s5210_s5 + $0xa8] sm:$0xff]  }
 0x7b2   :  { %3661 = vmatprep.subr.bf16.mxu0 %v3933_v0 }
 0x7b3   :  { %1614 = vmatpush1.bf16.msra.mxu1 %v4622_v54 }
 0x7b4   :  { %3292 = vmatprep.subr.bf16.mxu1 %v4628_v11 }
 0x7b6   :  { %3031 = vmatmul.mubr.msk.bf16.vlgmr.msra.gmra.mxu1 %vm210_vm2, %v3030_v16 }
 0x7b7   :  { %3293 = vmatpush3.bf16.msra.mxu1 %v4635_v56 }
 0x7b8   :  { %3294 = vmatprep.subr.bf16.mxu1 %v4641_v14 }
 0x7bb   :  { %3295 = vmatpush3.bf16.msra.mxu1 %v4743_v38 }
 0x7bc   :  { %3296 = vmatprep.subr.bf16.mxu1 %v4749_v41 }
 0x7bf   :  { %3297 = vmatpush3.bf16.msra.mxu1 %v4755_v42 }
 0x7c0   :  { %3298 = vmatprep.subr.bf16.mxu1 %v4761_v43 }
 0x7c3   :  { %3299 = vmatpush3.bf16.msra.mxu1 %v4767_v17 }
 0x7c4   :  { %3300 = vmatprep.subr.bf16.mxu1 %v4773_v20 }
 0x7c7   :  { %3301 = vmatpush3.bf16.msra.mxu1 %v4779_v57 }
 0x7c8   :  { %3302 = vmatprep.subr.bf16.mxu1 %v4785_v58 }
 0x7cb   :  { %3303 = vmatpush3.bf16.msra.mxu1 %v4791_v52 }
 0x7cc   :  { %3304 = vmatprep.subr.bf16.mxu1 %v4797_v55 }
 0x7cf   :  { %3305 = vmatpush3.bf16.msra.mxu1 %v4803_v63 }
 0x7d0   :  { %3306 = vmatprep.subr.bf16.mxu1 %v4809_v1 }
 0x7d3   :  { %3307 = vmatpush3.bf16.msra.mxu1 %v4815_v3 }
 0x7d4   :  { %3671 = vmatprep.subr.bf16.mxu1 %v3933_v0 }
 0x85e   :  { %v1587_v16 = vpop.f32.mrf.mxu1 }
 0x85f   :  { %v4828_v21 = vadd.f32 %v1587_v16, %v4667_v39  ;;  %v3844_v39 = vld [vmem:[%s5210_s5 + $0xb0] sm:$0xff]  }
 0x860   :  { %v3633_v30 = vpop.f32.mrf.mxu1  ;;  %3662 = vmatpush3.bf16.msra.mxu0 %v3844_v39 }
 0x861   :  { %3663 = vmatprep.subr.bf16.mxu0 %v3933_v0 }
 0x862   :  { %v1590_v31 = vpop.f32.mrf.mxu1 }
 0x863   :  { %v3846_v31 = vld [vmem:[%s5210_s5 + $0xa0] sm:$0xff]  }
 0x864   :  { %v3634_v32 = vpop.f32.mrf.mxu1  ;;  %3664 = vmatpush3.bf16.msra.mxu0 %v3845_v15 }
 0x865   :  { %3665 = vmatprep.subr.bf16.mxu0 %v3933_v0  ;;  %v3039_v32 = vld [vmem:[%s5208_s0 + $0x18] sm:$0xf] }
 0x868   :  { %3666 = vmatpush3.bf16.msra.mxu0 %v3846_v31 }
 0x869   :  { %1856 = vmatprep.subr.bf16.mxu0 %v4007_v7 }
 0x870   :  { %v1763_v12 = vpop.f32.mrf.mxu0 }
 0x872   :  { %v3657_v13 = vpop.f32.mrf.mxu0 }
 0x874   :  { %v1766_v16 = vpop.f32.mrf.mxu0 }
 0x876   :  { %v1633_v33 = vpop.f32.mrf.mxu1  ;;  %v3658_v30 = vpop.f32.mrf.mxu0 }
 0x877   :  { %v1634_v34 = vadd.f32 %v1633_v33, %v4242_v51  ;;  %v3847_v30 = vld [vmem:[%s5210_s5 + $0xd8] sm:$0xff]  }
 0x878   :  { %v1635_v35 = vpop.f32.mrf.mxu1 }
 0x879   :  { %v1636_v36 = vadd.f32 %v1635_v35, %v4246_v53  ;;  %v1680_v37 = vmax.f32 %v1634_v34, 0.0 }
 0x87a   :  { %v1637_v5 = vpop.f32.mrf.mxu1 }
 0x87b   :  { %v1681_v23 = vmax.f32 %v1636_v36, 0.0  ;;  %v1683_v10 = vpack.c.bf16 %v1680_v37, %v1680_v37 }
 0x87c   :  { %v1638_v46 = vpop.f32.mrf.mxu1 }
 0x87d   :  { %v1684_v6 = vpack.c.bf16 %v1681_v23, %v1681_v23 }
 0x87f   :  { %1721 = vmatprep.mubr.bf16.mxu1 %v1684_v6 }
 0x880   :  { %1722 = vmatmul.mubr.bf16.vlgmr.msra.gmra.mxu1 %v1683_v10 }
 0x881   :  { %3672 = vmatpush3.bf16.msra.mxu1 %v4009_v8  ;;  %3683 = vmatprep.mubr.msk.bf16.mxu1 %vm3935_vm1, %v3933_v0 }
 0x882   :  { %3673 = vmatprep.subr.bf16.mxu1 %v3933_v0 }
 0x885   :  { %3674 = vmatpush3.bf16.msra.mxu1 %v4512_v4 }
 0x886   :  { %3675 = vmatprep.subr.bf16.mxu1 %v3933_v0 }
 0x889   :  { %3676 = vmatpush3.bf16.msra.mxu1 %v4519_v61 }
 0x88a   :  { %3677 = vmatprep.subr.bf16.mxu1 %v3933_v0 }
 0x88d   :  { %3678 = vmatpush3.bf16.msra.mxu1 %v4526_v60 }
 0x88e   :  { %3679 = vmatprep.subr.bf16.mxu1 %v3933_v0 }
 0x891   :  { %3680 = vmatpush3.bf16.msra.mxu1 %v4533_v62 }
 0x892   :  { %3681 = vmatprep.subr.bf16.mxu1 %v3933_v0 }
 0x895   :  { %3682 = vmatpush3.bf16.msra.mxu1 %v4686_v26 }
 0x896   :  { %3687 = vmatprep.subr.bf16.mxu1 %v3933_v0 }
 0x898   :  { %3684 = vmatmul.mubr.msk.bf16.vlgmr.msra.gmra.mxu1 %vm210_vm2, %v3039_v32 }
 0x899   :  { %3688 = vmatpush3.bf16.msra.mxu1 %v4709_v18  ;;  %3691 = vmatprep.mubr.msk.bf16.mxu1 %vm3935_vm1, %v3933_v0 }
 0x89a   :  { %3689 = vmatprep.subr.bf16.mxu1 %v3933_v0 }
 0x89d   :  { %3690 = vmatpush3.bf16.msra.mxu1 %v4718_v19 }
 0x89e   :  { %3695 = vmatprep.subr.bf16.mxu1 %v3933_v0 }
 0x940   :  { %v3308_v33 = vpop.f32.mrf.mxu1 }
 0x942   :  { %v3309_v34 = vpop.f32.mrf.mxu1 }
 0x943   :  { %v3310_v35 = vadd.f32 %v3309_v34, %v3308_v33 }
 0x944   :  { %v3311_v36 = vpop.f32.mrf.mxu1 }
 0x945   :  { %v1724_v37 = vadd.f32 %v3310_v35, %v4315_v59 }
 0x946   :  { %v3312_v5 = vpop.f32.mrf.mxu1 }
 0x947   :  { %v1764_v23 = vadd.f32 %v1763_v12, %v1724_v37 }
 0x949   :  { %v1769_v46 = vmax.f32 %v1764_v23, 0.0 }
 0x94b   :  { %v1770_v6 = vpack.c.bf16 %v1769_v46, %v1769_v46 }
 0x94d   :  { %3668 = vmatmul.mubr.msk.bf16.vlgmr.msra.gmra.mxu0 %vm724_vm4, %v1770_v6 }
 0x94e   :  { %1857 = vmatpush1.bf16.msra.mxu0 %v4011_v9  ;;  %1884 = vmatprep.mubr.bf16.mxu0 %v3934_v2 }
 0x94f   :  { %1858 = vmatprep.subr.bf16.mxu0 %v4568_v28 }
 0x952   :  { %1859 = vmatpush1.bf16.msra.mxu0 %v4574_v40 }
 0x953   :  { %1860 = vmatprep.subr.bf16.mxu0 %v4580_v22 }
 0x956   :  { %1861 = vmatpush1.bf16.msra.mxu0 %v4586_v24 }
 0x957   :  { %1862 = vmatprep.subr.bf16.mxu0 %v4592_v27 }
 0x958   :  { %v1927_v59 = vpop.f32.mrf.mxu1 }
 0x959   :  { %v1928_v10 = vadd.f32 %v1927_v59, %v4238_v50 }
 0x95a   :  { %1863 = vmatpush1.bf16.msra.mxu0 %v4598_v29  ;;  %v3685_v39 = vpop.f32.mrf.mxu1 }
 0x95b   :  { %1864 = vmatprep.subr.bf16.mxu0 %v4604_v25  ;;  %v1935_v12 = vmax.f32 %v1928_v10, 0.0 }
 0x95c   :  { %v1930_v13 = vpop.f32.mrf.mxu1 }
 0x95d   :  { %v1938_v15 = vpack.c.bf16 %v1935_v12, %v1935_v12 }
 0x95e   :  { %1865 = vmatpush1.bf16.msra.mxu0 %v4610_v44  ;;  %v3686_v16 = vpop.f32.mrf.mxu1 }
 0x95f   :  { %1866 = vmatprep.subr.bf16.mxu0 %v4616_v47  ;;  %3692 = vmatmul.mubr.msk.bf16.vlgmr.msra.gmra.mxu1 %vm421_vm3, %v1938_v15  ;;  %v3849_v16 = vld [vmem:[%s5210_s5 + $0xc8] sm:$0xff]  }
 0x960   :  { %3703 = vmatprep.mubr.msk.bf16.mxu1 %vm3935_vm1, %v3933_v0  ;;  %3696 = vmatpush3.bf16.msra.mxu1 %v3847_v30 }
 0x961   :  { %3697 = vmatprep.subr.bf16.mxu1 %v3933_v0 }
 0x962   :  { %1867 = vmatpush1.bf16.msra.mxu0 %v4622_v54 }
 0x963   :  { %3329 = vmatprep.subr.bf16.mxu0 %v4628_v11 }
 0x965   :  { %3040 = vmatmul.mubr.msk.bf16.vlgmr.msra.gmra.mxu0 %vm210_vm2, %v3039_v32 }
 0x966   :  { %3330 = vmatpush3.bf16.msra.mxu0 %v4635_v56 }
 0x967   :  { %3331 = vmatprep.subr.bf16.mxu0 %v4641_v14 }
 0x96a   :  { %3332 = vmatpush3.bf16.msra.mxu0 %v4743_v38 }
 0x96b   :  { %3333 = vmatprep.subr.bf16.mxu0 %v4749_v41 }
 0x96e   :  { %3334 = vmatpush3.bf16.msra.mxu0 %v4755_v42 }
 0x96f   :  { %3335 = vmatprep.subr.bf16.mxu0 %v4761_v43 }
 0x972   :  { %3336 = vmatpush3.bf16.msra.mxu0 %v4767_v17 }
 0x973   :  { %3337 = vmatprep.subr.bf16.mxu0 %v4773_v20 }
 0x976   :  { %3338 = vmatpush3.bf16.msra.mxu0 %v4779_v57 }
 0x977   :  { %3339 = vmatprep.subr.bf16.mxu0 %v4785_v58 }
 0x97a   :  { %3340 = vmatpush3.bf16.msra.mxu0 %v4791_v52 }
 0x97b   :  { %3341 = vmatprep.subr.bf16.mxu0 %v4797_v55 }
 0x97e   :  { %3342 = vmatpush3.bf16.msra.mxu0 %v4803_v63 }
 0x97f   :  { %3343 = vmatprep.subr.bf16.mxu0 %v4809_v1 }
 0x982   :  { %3344 = vmatpush3.bf16.msra.mxu0 %v4815_v3 }
 0x983   :  { %3707 = vmatprep.subr.bf16.mxu0 %v3933_v0 }
 0xa0d   :  { %v1840_v31 = vpop.f32.mrf.mxu0 }
 0xa0e   :  { %v4909_v32 = vadd.f32 %v1840_v31, %v4828_v21  ;;  %v3848_v21 = vld [vmem:[%s5210_s5 + $0xd0] sm:$0xff]  }
 0xa0f   :  { %v3669_v33 = vpop.f32.mrf.mxu0  ;;  %3698 = vmatpush3.bf16.msra.mxu1 %v3848_v21 }
 0xa10   :  { %3699 = vmatprep.subr.bf16.mxu1 %v3933_v0  ;;  %v3850_v33 = vld [vmem:[%s5210_s5 + $0xc0] sm:$0xff]  }
 0xa11   :  { %v1843_v34 = vpop.f32.mrf.mxu0 }
 0xa12   :  { %v3048_v34 = vld [vmem:[%s5208_s0 + $0x1c] sm:$0xf] }
 0xa13   :  { %v3670_v35 = vpop.f32.mrf.mxu0  ;;  %3700 = vmatpush3.bf16.msra.mxu1 %v3849_v16 }
 0xa14   :  { %3701 = vmatprep.subr.bf16.mxu1 %v3933_v0 }
 0xa17   :  { %3702 = vmatpush3.bf16.msra.mxu1 %v3850_v33  ;;  %v3851_v33 = vld [vmem:[%s5210_s5 + $0xf8] sm:$0xff]  }
 0xa18   :  { %2109 = vmatprep.subr.bf16.mxu1 %v4007_v7 }
 0xa1f   :  { %v2016_v13 = vpop.f32.mrf.mxu1 }
 0xa21   :  { %v3693_v15 = vpop.f32.mrf.mxu1 }
 0xa23   :  { %v2019_v30 = vpop.f32.mrf.mxu1 }
 0xa25   :  { %v1886_v36 = vpop.f32.mrf.mxu0  ;;  %v3694_v31 = vpop.f32.mrf.mxu1 }
 0xa26   :  { %v1887_v37 = vadd.f32 %v1886_v36, %v4242_v51 }
 0xa27   :  { %v1888_v5 = vpop.f32.mrf.mxu0 }
 0xa28   :  { %v1889_v23 = vadd.f32 %v1888_v5, %v4246_v53  ;;  %v1933_v46 = vmax.f32 %v1887_v37, 0.0 }
 0xa29   :  { %v1890_v6 = vpop.f32.mrf.mxu0 }
 0xa2a   :  { %v1934_v59 = vmax.f32 %v1889_v23, 0.0  ;;  %v1936_v12 = vpack.c.bf16 %v1933_v46, %v1933_v46  ;;  %v4952_v23 = vld [vmem:[%s5211_s4] ss:$0 sm:$0xff] }
 0xa2b   :  { %v1891_v10 = vpop.f32.mrf.mxu0 }
 0xa2c   :  { %v1937_v39 = vpack.c.bf16 %v1934_v59, %v1934_v59 }
 0xa2e   :  { %1974 = vmatprep.mubr.bf16.mxu0 %v1937_v39 }
 0xa2f   :  { %1975 = vmatmul.mubr.bf16.vlgmr.msra.gmra.mxu0 %v1936_v12 }
 0xa30   :  { %3708 = vmatpush3.bf16.msra.mxu0 %v4009_v8  ;;  %3719 = vmatprep.mubr.msk.bf16.mxu0 %vm3935_vm1, %v3933_v0 }
 0xa31   :  { %3709 = vmatprep.subr.bf16.mxu0 %v3933_v0 }
 0xa34   :  { %3710 = vmatpush3.bf16.msra.mxu0 %v4512_v4 }
 0xa35   :  { %3711 = vmatprep.subr.bf16.mxu0 %v3933_v0 }
 0xa38   :  { %3712 = vmatpush3.bf16.msra.mxu0 %v4519_v61 }
 0xa39   :  { %3713 = vmatprep.subr.bf16.mxu0 %v3933_v0 }
 0xa3c   :  { %3714 = vmatpush3.bf16.msra.mxu0 %v4526_v60 }
 0xa3d   :  { %3715 = vmatprep.subr.bf16.mxu0 %v3933_v0 }
 0xa40   :  { %3716 = vmatpush3.bf16.msra.mxu0 %v4533_v62 }
 0xa41   :  { %3717 = vmatprep.subr.bf16.mxu0 %v3933_v0 }
 0xa44   :  { %3718 = vmatpush3.bf16.msra.mxu0 %v4686_v26 }
 0xa45   :  { %3723 = vmatprep.subr.bf16.mxu0 %v3933_v0 }
 0xa47   :  { %3720 = vmatmul.mubr.msk.bf16.vlgmr.msra.gmra.mxu0 %vm210_vm2, %v3048_v34 }
 0xa48   :  { %3724 = vmatpush3.bf16.msra.mxu0 %v4709_v18  ;;  %3727 = vmatprep.mubr.msk.bf16.mxu0 %vm3935_vm1, %v3933_v0 }
 0xa49   :  { %3725 = vmatprep.subr.bf16.mxu0 %v3933_v0 }
 0xa4c   :  { %3726 = vmatpush3.bf16.msra.mxu0 %v4718_v19 }
 0xa4d   :  { %3731 = vmatprep.subr.bf16.mxu0 %v3933_v0 }
 0xaef   :  { %v3345_v35 = vpop.f32.mrf.mxu0 }
 0xaf1   :  { %v3346_v36 = vpop.f32.mrf.mxu0 }
 0xaf2   :  { %v3347_v37 = vadd.f32 %v3346_v36, %v3345_v35 }
 0xaf3   :  { %v3348_v5 = vpop.f32.mrf.mxu0 }
 0xaf4   :  { %v1977_v46 = vadd.f32 %v4952_v23, %v3347_v37 }
 0xaf5   :  { %v3349_v6 = vpop.f32.mrf.mxu0 }
 0xaf6   :  { %v2017_v59 = vadd.f32 %v2016_v13, %v1977_v46 }
 0xaf8   :  { %v2022_v10 = vmax.f32 %v2017_v59, 0.0 }
 0xafa   :  { %v2023_v39 = vpack.c.bf16 %v2022_v10, %v2022_v10 }
 0xafc   :  { %3704 = vmatmul.mubr.msk.bf16.vlgmr.msra.gmra.mxu1 %vm724_vm4, %v2023_v39 }
 0xafd   :  { %2110 = vmatpush1.bf16.msra.mxu1 %v4011_v9  ;;  %2137 = vmatprep.mubr.bf16.mxu1 %v3934_v2 }
 0xafe   :  { %2111 = vmatprep.subr.bf16.mxu1 %v4568_v28 }
 0xb01   :  { %2112 = vmatpush1.bf16.msra.mxu1 %v4574_v40 }
 0xb02   :  { %2113 = vmatprep.subr.bf16.mxu1 %v4580_v22 }
 0xb05   :  { %2114 = vmatpush1.bf16.msra.mxu1 %v4586_v24 }
 0xb06   :  { %2115 = vmatprep.subr.bf16.mxu1 %v4592_v27 }
 0xb07   :  { %v2180_v12 = vpop.f32.mrf.mxu0 }
 0xb08   :  { %v2181_v21 = vadd.f32 %v2180_v12, %v4238_v50 }
 0xb09   :  { %2116 = vmatpush1.bf16.msra.mxu1 %v4598_v29  ;;  %v3721_v13 = vpop.f32.mrf.mxu0 }
 0xb0a   :  { %2117 = vmatprep.subr.bf16.mxu1 %v4604_v25  ;;  %v2188_v15 = vmax.f32 %v2181_v21, 0.0 }
 0xb0b   :  { %v2183_v16 = vpop.f32.mrf.mxu0 }
 0xb0c   :  { %v2191_v30 = vpack.c.bf16 %v2188_v15, %v2188_v15 }
 0xb0d   :  { %2118 = vmatpush1.bf16.msra.mxu1 %v4610_v44  ;;  %v3722_v31 = vpop.f32.mrf.mxu0 }
 0xb0e   :  { %2119 = vmatprep.subr.bf16.mxu1 %v4616_v47  ;;  %3728 = vmatmul.mubr.msk.bf16.vlgmr.msra.gmra.mxu0 %vm421_vm3, %v2191_v30  ;;  %v3057_v30 = vld [vmem:[%s5208_s0 + $0x20] sm:$0xf] }
 0xb0f   :  { %3739 = vmatprep.mubr.msk.bf16.mxu0 %vm3935_vm1, %v3933_v0  ;;  %3732 = vmatpush3.bf16.msra.mxu0 %v3851_v33 }
 0xb10   :  { %3733 = vmatprep.subr.bf16.mxu0 %v3933_v0 }
 0xb11   :  { %2120 = vmatpush1.bf16.msra.mxu1 %v4622_v54 }
 0xb12   :  { %3366 = vmatprep.subr.bf16.mxu1 %v4628_v11 }
 0xb14   :  { %3049 = vmatmul.mubr.msk.bf16.vlgmr.msra.gmra.mxu1 %vm210_vm2, %v3048_v34 }
 0xb15   :  { %3367 = vmatpush3.bf16.msra.mxu1 %v4635_v56 }
 0xb16   :  { %3368 = vmatprep.subr.bf16.mxu1 %v4641_v14 }
 0xb19   :  { %3369 = vmatpush3.bf16.msra.mxu1 %v4743_v38 }
 0xb1a   :  { %3370 = vmatprep.subr.bf16.mxu1 %v4749_v41 }
 0xb1d   :  { %3371 = vmatpush3.bf16.msra.mxu1 %v4755_v42 }
 0xb1e   :  { %3372 = vmatprep.subr.bf16.mxu1 %v4761_v43 }
 0xb21   :  { %3373 = vmatpush3.bf16.msra.mxu1 %v4767_v17 }
 0xb22   :  { %3374 = vmatprep.subr.bf16.mxu1 %v4773_v20 }
 0xb25   :  { %3375 = vmatpush3.bf16.msra.mxu1 %v4779_v57 }
 0xb26   :  { %3376 = vmatprep.subr.bf16.mxu1 %v4785_v58 }
 0xb29   :  { %3377 = vmatpush3.bf16.msra.mxu1 %v4791_v52 }
 0xb2a   :  { %3378 = vmatprep.subr.bf16.mxu1 %v4797_v55 }
 0xb2d   :  { %3379 = vmatpush3.bf16.msra.mxu1 %v4803_v63 }
 0xb2e   :  { %3380 = vmatprep.subr.bf16.mxu1 %v4809_v1 }
 0xb31   :  { %3381 = vmatpush3.bf16.msra.mxu1 %v4815_v3 }
 0xb32   :  { %3743 = vmatprep.subr.bf16.mxu1 %v3933_v0 }
 0xbbc   :  { %v2093_v34 = vpop.f32.mrf.mxu1 }
 0xbbd   :  { %v4995_v35 = vadd.f32 %v2093_v34, %v4909_v32 }
 0xbbe   :  { %v3705_v36 = vpop.f32.mrf.mxu1 }
 0xbc0   :  { %v2096_v37 = vpop.f32.mrf.mxu1 }
 0xbc2   :  { %v3706_v5 = vpop.f32.mrf.mxu1 }
 0xbd4   :  { %v2139_v46 = vpop.f32.mrf.mxu1 }
 0xbd5   :  { %v2140_v6 = vadd.f32 %v2139_v46, %v4242_v51 }
 0xbd6   :  { %v2141_v59 = vpop.f32.mrf.mxu1 }
 0xbd7   :  { %v2142_v10 = vadd.f32 %v2141_v59, %v4246_v53  ;;  %v2186_v39 = vmax.f32 %v2140_v6, 0.0 }
 0xbd8   :  { %v2143_v12 = vpop.f32.mrf.mxu1 }
 0xbd9   :  { %v2187_v21 = vmax.f32 %v2142_v10, 0.0  ;;  %v2189_v16 = vpack.c.bf16 %v2186_v39, %v2186_v39 }
 0xbda   :  { %v2144_v13 = vpop.f32.mrf.mxu1 }
 0xbdb   :  { %v2190_v15 = vpack.c.bf16 %v2187_v21, %v2187_v21 }
 0xbdd   :  { %2227 = vmatprep.mubr.bf16.mxu1 %v2190_v15 }
 0xbde   :  { %2228 = vmatmul.mubr.bf16.vlgmr.msra.gmra.mxu1 %v2189_v16  ;;  %v3864_v16 = vld [vmem:[%s5212_s7 + $0x64] ss:$8 sps:$4 sm:$0xff]  }
 0xbdf   :  { %3744 = vmatpush3.bf16.msra.mxu1 %v4009_v8  ;;  %3755 = vmatprep.mubr.msk.bf16.mxu1 %vm3935_vm1, %v3933_v0  ;;  %v3852_v8 = vld [vmem:[%s5210_s5 + $0xf0] sm:$0xff]  }
 0xbe0   :  { %3745 = vmatprep.subr.bf16.mxu1 %v3933_v0  ;;  %3734 = vmatpush3.bf16.msra.mxu0 %v3852_v8  ;;  %v3862_v8 = vld [vmem:[%s5212_s7 + $0x60] ss:$8 sps:$4 sm:$0xff]  }
 0xbe1   :  { %3735 = vmatprep.subr.bf16.mxu0 %v3933_v0 }
 0xbe3   :  { %3746 = vmatpush3.bf16.msra.mxu1 %v4512_v4  ;;  %v2269_v4 = vpop.f32.mrf.mxu0 }
 0xbe4   :  { %3747 = vmatprep.subr.bf16.mxu1 %v3933_v0 }
 0xbe7   :  { %3748 = vmatpush3.bf16.msra.mxu1 %v4519_v61  ;;  %v3729_v61 = vpop.f32.mrf.mxu0 }
 0xbe8   :  { %3749 = vmatprep.subr.bf16.mxu1 %v3933_v0  ;;  %v3870_v61 = vld [vmem:[%s5212_s7 + $0x44] ss:$8 sps:$4 sm:$0xff]  }
 0xbeb   :  { %3750 = vmatpush3.bf16.msra.mxu1 %v4526_v60  ;;  %v3853_v60 = vld [vmem:[%s5210_s5 + $0xe8] sm:$0xff]  }
 0xbec   :  { %3751 = vmatprep.subr.bf16.mxu1 %v3933_v0  ;;  %3736 = vmatpush3.bf16.msra.mxu0 %v3853_v60  ;;  %v3873_v60 = vld [vmem:[%s5212_s7 + $0x34] ss:$8 sps:$4 sm:$0xff]  }
 0xbed   :  { %3737 = vmatprep.subr.bf16.mxu0 %v3933_v0 }
 0xbef   :  { %3752 = vmatpush3.bf16.msra.mxu1 %v4533_v62  ;;  %v2272_v62 = vpop.f32.mrf.mxu0 }
 0xbf0   :  { %3753 = vmatprep.subr.bf16.mxu1 %v3933_v0  ;;  %v3871_v62 = vld [vmem:[%s5212_s7 + $0x30] ss:$8 sps:$4 sm:$0xff]  }
 0xbf1   :  { %v3730_v32 = vpop.f32.mrf.mxu0 }
 0xbf2   :  { %v3876_v32 = vld [vmem:[%s5212_s7 + $0x24] ss:$8 sps:$4 sm:$0xff]  }
 0xbf3   :  { %3754 = vmatpush3.bf16.msra.mxu1 %v4686_v26  ;;  %v3854_v26 = vld [vmem:[%s5210_s5 + $0xe0] sm:$0xff]  }
 0xbf4   :  { %3759 = vmatprep.subr.bf16.mxu1 %v3933_v0  ;;  %3738 = vmatpush3.bf16.msra.mxu0 %v3854_v26  ;;  %v3874_v26 = vld [vmem:[%s5212_s7 + $0x20] ss:$8 sps:$4 sm:$0xff]  }
 0xbf5   :  { %2362 = vmatprep.subr.bf16.mxu0 %v4007_v7 }
 0xbf6   :  { %3756 = vmatmul.mubr.msk.bf16.vlgmr.msra.gmra.mxu1 %vm210_vm2, %v3057_v30 }
 0xbf7   :  { %3760 = vmatpush3.bf16.msra.mxu1 %v4709_v18  ;;  %3763 = vmatprep.mubr.msk.bf16.mxu1 %vm3935_vm1, %v3933_v0 }
 0xbf8   :  { %3761 = vmatprep.subr.bf16.mxu1 %v3933_v0 }
 0xbfb   :  { %3762 = vmatpush3.bf16.msra.mxu1 %v4718_v19 }
 0xbfc   :  { %3767 = vmatprep.subr.bf16.mxu1 %v3933_v0 }
 0xc9e   :  { %v3382_v31 = vpop.f32.mrf.mxu1 }
 0xca0   :  { %v3383_v33 = vpop.f32.mrf.mxu1 }
 0xca1   :  { %v3384_v7 = vadd.f32 %v3383_v33, %v3382_v31  ;;  %v3877_v31 = vld [vmem:[%s5212_s7 + $0x10] ss:$8 sps:$4 sm:$0xff]   ;;  %v3882_v33 = vld [vmem:[%s5212_s7 + $0x4] ss:$8 sps:$4 sm:$0xff]  }
 0xca2   :  { %v3385_v34 = vpop.f32.mrf.mxu1 }
 0xca3   :  { %v2230_v36 = vadd.f32 %v4952_v23, %v3384_v7  ;;  %v3880_v7 = vld [vmem:[%s5212_s7] ss:$8 sps:$4 sm:$0xff]   ;;  %v3883_v34 = vld [vmem:[%s5213_s9 + $0x78] sm:$0xff]  }
 0xca4   :  { %v3386_v37 = vpop.f32.mrf.mxu1 }
 0xca5   :  { %v2270_v5 = vadd.f32 %v2269_v4, %v2230_v36  ;;  %v3865_v4 = vld [vmem:[%s5212_s7 + $0x50] ss:$8 sps:$4 sm:$0xff]  }
 0xca6   :  { %v3884_v36 = vld [vmem:[%s5213_s9 + $0x38] sm:$0xff]   ;;  %v3885_v37 = vld [vmem:[%s5213_s9 + $0x70] sm:$0xff]  }
 0xca7   :  { %v2275_v46 = vmax.f32 %v2270_v5, 0.0  ;;  %v3886_v5 = vld [vmem:[%s5213_s9 + $0x30] sm:$0xff]  }
 0xca9   :  { %v2276_v6 = vpack.c.bf16 %v2275_v46, %v2275_v46  ;;  %v3887_v46 = vld [vmem:[%s5213_s9 + $0x68] sm:$0xff]  }
 0xcab   :  { %3740 = vmatmul.mubr.msk.bf16.vlgmr.msra.gmra.mxu0 %vm724_vm4, %v2276_v6  ;;  %v3888_v6 = vld [vmem:[%s5213_s9 + $0x28] sm:$0xff]  }
 0xcac   :  { %2363 = vmatpush1.bf16.msra.mxu0 %v4011_v9  ;;  %2390 = vmatprep.mubr.bf16.mxu0 %v3934_v2 }
 0xcad   :  { %2364 = vmatprep.subr.bf16.mxu0 %v4568_v28 }
 0xcb0   :  { %2365 = vmatpush1.bf16.msra.mxu0 %v4574_v40 }
 0xcb1   :  { %2366 = vmatprep.subr.bf16.mxu0 %v4580_v22 }
 0xcb4   :  { %2367 = vmatpush1.bf16.msra.mxu0 %v4586_v24 }
 0xcb5   :  { %2368 = vmatprep.subr.bf16.mxu0 %v4592_v27 }
 0xcb6   :  { %v2433_v9 = vpop.f32.mrf.mxu1 }
 0xcb7   :  { %v2434_v28 = vadd.f32 %v2433_v9, %v4238_v50  ;;  %v3889_v9 = vld [vmem:[%s5213_s9 + $0x60] sm:$0xff]  }
 0xcb8   :  { %2369 = vmatpush1.bf16.msra.mxu0 %v4598_v29  ;;  %v3757_v40 = vpop.f32.mrf.mxu1 }
 0xcb9   :  { %2370 = vmatprep.subr.bf16.mxu0 %v4604_v25  ;;  %v2441_v22 = vmax.f32 %v2434_v28, 0.0  ;;  %v3855_v25 = vld [vmem:[%s5210_s5 + $0x118] sm:$0xff]   ;;  %v3890_v28 = vld [vmem:[%s5213_s9 + $0x20] sm:$0xff]  }
 0xcba   :  { %v2436_v24 = vpop.f32.mrf.mxu1  ;;  %v3891_v40 = vld [vmem:[%s5213_s9 + $0x58] sm:$0xff]  }
 0xcbb   :  { %v2444_v27 = vpack.c.bf16 %v2441_v22, %v2441_v22  ;;  %v3892_v22 = vld [vmem:[%s5213_s9 + $0x18] sm:$0xff]   ;;  %v3893_v24 = vld [vmem:[%s5213_s9 + $0x50] sm:$0xff]  }
 0xcbc   :  { %2371 = vmatpush1.bf16.msra.mxu0 %v4610_v44  ;;  %v3758_v29 = vpop.f32.mrf.mxu1 }
 0xcbd   :  { %2372 = vmatprep.subr.bf16.mxu0 %v4616_v47  ;;  %3764 = vmatmul.mubr.msk.bf16.vlgmr.msra.gmra.mxu1 %vm421_vm3, %v2444_v27  ;;  %v3894_v27 = vld [vmem:[%s5213_s9 + $0x10] sm:$0xff]  }
 0xcbe   :  { %3775 = vmatprep.mubr.msk.bf16.mxu1 %vm3935_vm1, %v3933_v0  ;;  %3768 = vmatpush3.bf16.msra.mxu1 %v3855_v25  ;;  %v3066_v25 = vld [vmem:[%s5214_s6] ss:$0 sm:$0xff] }
 0xcbf   :  { %3769 = vmatprep.subr.bf16.mxu1 %v3933_v0 }
 0xcc0   :  { %2373 = vmatpush1.bf16.msra.mxu0 %v4622_v54 }
 0xcc1   :  { %3403 = vmatprep.subr.bf16.mxu0 %v4628_v11 }
 0xcc3   :  { %3058 = vmatmul.mubr.msk.bf16.vlgmr.msra.gmra.mxu0 %vm210_vm2, %v3057_v30  ;;  %v3879_v30 = vld [vmem:[%s5212_s7 + $0x14] ss:$8 sps:$4 sm:$0xff]  }
 0xcc4   :  { %3404 = vmatpush3.bf16.msra.mxu0 %v4635_v56 }
 0xcc5   :  { %3405 = vmatprep.subr.bf16.mxu0 %v4641_v14 }
 0xcc8   :  { %3406 = vmatpush3.bf16.msra.mxu0 %v4743_v38 }
 0xcc9   :  { %3407 = vmatprep.subr.bf16.mxu0 %v4749_v41 }
 0xccc   :  { %3408 = vmatpush3.bf16.msra.mxu0 %v4755_v42 }
 0xccd   :  { %3409 = vmatprep.subr.bf16.mxu0 %v4761_v43 }
 0xcd0   :  { %3410 = vmatpush3.bf16.msra.mxu0 %v4767_v17 }
 0xcd1   :  { %3411 = vmatprep.subr.bf16.mxu0 %v4773_v20 }
 0xcd4   :  { %3412 = vmatpush3.bf16.msra.mxu0 %v4779_v57 }
 0xcd5   :  { %3413 = vmatprep.subr.bf16.mxu0 %v4785_v58  ;;  %v3856_v58 = vld [vmem:[%s5210_s5 + $0x110] sm:$0xff]  }
 0xcd6   :  { %3770 = vmatpush3.bf16.msra.mxu1 %v3856_v58 }
 0xcd7   :  { %3771 = vmatprep.subr.bf16.mxu1 %v3933_v0 }
 0xcd8   :  { %3414 = vmatpush3.bf16.msra.mxu0 %v4791_v52 }
 0xcd9   :  { %3415 = vmatprep.subr.bf16.mxu0 %v4797_v55 }
 0xcdc   :  { %3416 = vmatpush3.bf16.msra.mxu0 %v4803_v63  ;;  %v3858_v63 = vld [vmem:[%s5210_s5 + $0x100] sm:$0xff]  }
 0xcdd   :  { %3417 = vmatprep.subr.bf16.mxu0 %v4809_v1  ;;  %v3861_v1 = vld [vmem:[%s5212_s7 + $0x74] ss:$8 sps:$4 sm:$0xff]  }
 0xce0   :  { %3418 = vmatpush3.bf16.msra.mxu0 %v4815_v3 }
 0xce1   :  { %3433 = vmatprep.subr.bf16.mxu0 %v3883_v34 }
 0xd6b   :  { %v2346_v44 = vpop.f32.mrf.mxu0 }
 0xd6c   :  { %v5075_v50 = vadd.f32 %v2346_v44, %v4995_v35 }
 0xd6d   :  { %v3741_v47 = vpop.f32.mrf.mxu0 }
 0xd6f   :  { %v2349_v54 = vpop.f32.mrf.mxu0 }
 0xd71   :  { %v3742_v11 = vpop.f32.mrf.mxu0 }
 0xd7d   :  { %v2522_v57 = vpop.f32.mrf.mxu1 }
 0xd7f   :  { %v3765_v52 = vpop.f32.mrf.mxu1 }
 0xd83   :  { %v2392_v56 = vpop.f32.mrf.mxu0 }
 0xd84   :  { %v2393_v14 = vadd.f32 %v2392_v56, %v4242_v51  ;;  %v2525_v51 = vpop.f32.mrf.mxu1 }
 0xd85   :  { %v2394_v18 = vpop.f32.mrf.mxu0 }
 0xd86   :  { %v2395_v19 = vadd.f32 %v2394_v18, %v4246_v53  ;;  %v2439_v38 = vmax.f32 %v2393_v14, 0.0  ;;  %v3857_v53 = vld [vmem:[%s5210_s5 + $0x108] sm:$0xff]   ;;  %v3766_v55 = vpop.f32.mrf.mxu1 }
 0xd87   :  { %v2396_v41 = vpop.f32.mrf.mxu0  ;;  %3772 = vmatpush3.bf16.msra.mxu1 %v3857_v53 }
 0xd88   :  { %v2440_v42 = vmax.f32 %v2395_v19, 0.0  ;;  %v2442_v20 = vpack.c.bf16 %v2439_v38, %v2439_v38  ;;  %3773 = vmatprep.subr.bf16.mxu1 %v3933_v0  ;;  %v3859_v0 = vld [vmem:[%s5212_s7 + $0x70] ss:$8 sps:$4 sm:$0xff]   ;;  %v3895_v19 = vld [vmem:[%s5213_s9 + $0x48] sm:$0xff]   ;;  %v3898_v41 = vld [vmem:[%s5213_s9] sm:$0xff]  }
 0xd89   :  { %v2397_v43 = vpop.f32.mrf.mxu0  ;;  %v3896_v38 = vld [vmem:[%s5213_s9 + $0x8] sm:$0xff]  }
 0xd8a   :  { %v2443_v17 = vpack.c.bf16 %v2440_v42, %v2440_v42  ;;  %v2632_v42 = vld [vmem:[%s5215_s8] sm:$0x3] }
 0xd8b   :  { %3774 = vmatpush3.bf16.msra.mxu1 %v3858_v63  ;;  %v2637_v43 = vrot.slane %v2632_v42, %v43_v48  ;;  %v3083_v48 = vld [vmem:[%s5216_s10] ss:$0 sm:$0xff] }
 0xd8c   :  { %2480 = vmatprep.mubr.bf16.mxu0 %v2443_v17  ;;  %2724 = vmatprep.subr.bf16.mxu1 %v3861_v1  ;;  %v2641_v17 = vrot.slane %v2632_v42, %v47_v49 }
 0xd8d   :  { %2481 = vmatmul.mubr.bf16.vlgmr.msra.gmra.mxu0 %v2442_v20 }
 0xd8e   :  { %3434 = vmatpush3.bf16.msra.mxu0 %v3884_v36 }
 0xd8f   :  { %3435 = vmatprep.subr.bf16.mxu0 %v3885_v37 }
 0xd92   :  { %3436 = vmatpush3.bf16.msra.mxu0 %v3886_v5 }
 0xd93   :  { %3437 = vmatprep.subr.bf16.mxu0 %v3887_v46 }
 0xd96   :  { %3438 = vmatpush3.bf16.msra.mxu0 %v3888_v6 }
 0xd97   :  { %3439 = vmatprep.subr.bf16.mxu0 %v3889_v9 }
 0xd9a   :  { %3440 = vmatpush3.bf16.msra.mxu0 %v3890_v28 }
 0xd9b   :  { %3441 = vmatprep.subr.bf16.mxu0 %v3891_v40 }
 0xd9e   :  { %3442 = vmatpush3.bf16.msra.mxu0 %v3892_v22 }
 0xd9f   :  { %3443 = vmatprep.subr.bf16.mxu0 %v3893_v24 }
 0xda2   :  { %3444 = vmatpush3.bf16.msra.mxu0 %v3894_v27 }
 0xda3   :  { %3445 = vmatprep.subr.bf16.mxu0 %v3895_v19 }
 0xda6   :  { %3446 = vmatpush3.bf16.msra.mxu0 %v3896_v38 }
 0xe4d   :  { %v3419_v3 = vpop.f32.mrf.mxu0 }
 0xe4f   :  { %v3420_v35 = vpop.f32.mrf.mxu0 }
 0xe50   :  { %v3421_v59 = vadd.f32 %v3420_v35, %v3419_v3 }
 0xe51   :  { %v3422_v10 = vpop.f32.mrf.mxu0 }
 0xe52   :  { %v2483_v39 = vadd.f32 %v4952_v23, %v3421_v59  ;;  %v3867_v23 = vld [vmem:[%s5212_s7 + $0x54] ss:$8 sps:$4 sm:$0xff]  }
 0xe53   :  { %v3423_v12 = vpop.f32.mrf.mxu0 }
 0xe54   :  { %v2523_v21 = vadd.f32 %v2522_v57, %v2483_v39 }
 0xe56   :  { %v2528_v13 = vmax.f32 %v2523_v21, 0.0 }
 0xe58   :  { %v2529_v15 = vpack.c.bf16 %v2528_v13, %v2528_v13 }
 0xe5a   :  { %3776 = vmatmul.mubr.msk.bf16.vlgmr.msra.gmra.mxu1 %vm724_vm4, %v2529_v15 }
 0xe5b   :  { %2725 = vmatpush1.bf16.msra.mxu1 %v3859_v0  ;;  %2756 = vmatprep.mubr.bf16.mxu1 %v3934_v2  ;;  %v3868_v2 = vld [vmem:[%s5212_s7 + $0x40] ss:$8 sps:$4 sm:$0xff]  }
 0xe5c   :  { %2726 = vmatprep.subr.bf16.mxu1 %v3864_v16 }
 0xe5f   :  { %2727 = vmatpush1.bf16.msra.mxu1 %v3862_v8 }
 0xe60   :  { %2728 = vmatprep.subr.bf16.mxu1 %v3867_v23 }
 0xe63   :  { %2729 = vmatpush1.bf16.msra.mxu1 %v3865_v4 }
 0xe64   :  { %2730 = vmatprep.subr.bf16.mxu1 %v3870_v61 }
 0xe67   :  { %2731 = vmatpush1.bf16.msra.mxu1 %v3868_v2 }
 0xe68   :  { %2732 = vmatprep.subr.bf16.mxu1 %v3873_v60 }
 0xe6b   :  { %2733 = vmatpush1.bf16.msra.mxu1 %v3871_v62 }
 0xe6c   :  { %2734 = vmatprep.subr.bf16.mxu1 %v3876_v32 }
 0xe6f   :  { %2735 = vmatpush1.bf16.msra.mxu1 %v3874_v26 }
 0xe70   :  { %2736 = vmatprep.subr.bf16.mxu1 %v3879_v30 }
 0xe73   :  { %2737 = vmatpush1.bf16.msra.mxu1 %v3877_v31 }
 0xe74   :  { %2738 = vmatprep.subr.bf16.mxu1 %v3882_v33 }
 0xe77   :  { %2739 = vmatpush1.bf16.msra.mxu1 %v3880_v7 }
 0xf1a   :  { %v2599_v29 = vpop.f32.mrf.mxu1 }
 0xf1b   :  { %v2605_v44 = vadd.f32 %v2599_v29, %v5075_v50  ;;  %v3897_v50 = vld [vmem:[%s5213_s9 + $0x40] sm:$0xff]  }
 0xf1c   :  { %v3777_v47 = vpop.f32.mrf.mxu1  ;;  %3447 = vmatprep.subr.bf16.mxu0 %v3897_v50 }
 0xf1d   :  { %v2613_v54 = vadd.f32 %v3066_v25, %v2605_v44  ;;  %3448 = vmatpush3.bf16.msra.mxu0 %v3898_v41 }
 0xf1e   :  { %v2602_v11 = vpop.f32.mrf.mxu1 }
 0xf1f   :  { %v2614_v56 = vmax.f32 %v2613_v54, 0.0 }
 0xf20   :  { %v3778_v14 = vpop.f32.mrf.mxu1 }
 0xf21   :  { %v2615_v18 = vpack.c.bf16 %v2614_v56, %v2614_v56 }
 0xf23   :  { %2757 = vmatmul.mubr.bf16.vlgmr.msra.gmra.mxu1 %v2615_v18 }
 0xfe3   :  { %v2758_v20 = vpop.f32.mrf.mxu1 }
 0xfe4   :  { %v2759_v57 = vadd.f32 %v2758_v20, %v2637_v43 }
 0xfe5   :  { %v2760_v58 = vpop.f32.mrf.mxu1 }
 0xfe6   :  { %v2761_v52 = vadd.f32 %v2760_v58, %v2641_v17  ;;  %v2765_v51 = vmax.f32 %v2759_v57, 0.0 }
 0xfe7   :  { %v2762_v53 = vpop.f32.mrf.mxu1 }
 0xfe8   :  { %v2766_v55 = vmax.f32 %v2761_v52, 0.0  ;;  %v2767_v3 = vpack.c.bf16 %v2765_v51, %v2765_v51 }
 0xfe9   :  { %v2763_v63 = vpop.f32.mrf.mxu1 }
 0xfea   :  { %v2768_v1 = vpack.c.bf16 %v2766_v55, %v2766_v55 }
 0xfec   :  { %2936 = vmatprep.mubr.bf16.mxu0 %v2768_v1 }
 0xfed   :  { %2937 = vmatmul.mubr.bf16.vlgmr.msra.gmra.mxu0 %v2767_v3 }
0x10ad   :  { %v3449_v35 = vpop.f32.mrf.mxu0 }
0x10af   :  { %v3450_v59 = vpop.f32.mrf.mxu0 }
0x10b0   :  { %v3451_v45 = vadd.f32 %v3450_v59, %v3449_v35 }
0x10b1   :  { %v3452_v49 = vpop.f32.mrf.mxu0 }
0x10b2   :  { %v2939_v10 = vadd.f32 %v3451_v45, %v3083_v48 }
0x10b3   :  { %v3453_v39 = vpop.f32.mrf.mxu0 }
0x10b4   :  { %2944 = vst [vmem:[%s5217_s11] sm:$0xff] %v2939_v10 }

</bundles_post_ra>
